<compile_context>
chip_gen: v7x
topology: tpu7x:2x2x1
jax: 0.10.0
libtpu: 0.0.40
codegen_flags: <defaults>
</compile_context>

<pallas_src>
import functools
from functools import reduce
from operator import __add__

import jax
import jax.numpy as jnp
from jax import lax
from jax.experimental import pallas as pl
from jax.experimental.pallas import tpu as pltpu


def custom_padding(kernel_sizes):
    """Faithful re-implementation of the PyTorch helper (returns (padH, padW))."""
    conv_padding = reduce(
        __add__,
        [(k // 2 + (k - 2 * (k // 2)) - 1, k // 2) for k in kernel_sizes[::-1]],
    )
    return (conv_padding[0], conv_padding[2])


def _round_up(x, m):
    return (x + m - 1) // m * m


def _cdiv(a, b):
    return -(-a // b)


def _choose_row_chunk(Ho, Wo, Cout):
    """Largest chunk of output rows whose f32 gate block stays within a modest
    VMEM budget.  When there is more than one chunk, the channel-major pixel
    axis of the c / h / out blocks must be a multiple of 128 lanes."""
    gate_budget = 4 << 20
    for th in range(Ho, 0, -1):
        if Ho % th:
            continue
        if (Ho // th) > 1 and (th * Wo) % 128 != 0:
            continue
        if th * Wo * 4 * Cout * 4 <= gate_budget:
            return th
    return Ho


# ---------------------------------------------------------------------------
# Pallas kernel: in-kernel im2col (per-tap MXU dots) + LSTM gate update
# ---------------------------------------------------------------------------
def _rnn_conv_kernel(x_ref, h_ref, c_ref, wi_ref, wh_ref, oh_ref, oc_ref, *,
                     sh, sw, kh, kw, khh, kwh, th, wo, cout):
    """One (batch, row-chunk) grid step.

    x_ref : (sh*sw, Hq, Wq, Cin_p)  bf16  stride-phase-split padded input (VMEM-resident per batch)
    h_ref : (1, Hqh, Wqh, Cout)     bf16  padded previous hidden state (VMEM-resident per batch)
    c_ref : (1, Cout, th*wo)        f32   previous cell state, channel-major chunk
    wi_ref: (kh*kw, Cin_p, 4*Cout)  bf16  per-tap input-conv weights (i/f/o columns pre-scaled by 0.5)
    wh_ref: (khh*kwh, Cout, 4*Cout) bf16  per-tap hidden-conv weights (i/f/o columns pre-scaled by 0.5)
    oh_ref: (1, Cout, th*wo)        f32   new hidden state (channel-major chunk)
    oc_ref: (1, Cout, th*wo)        f32   new cell state   (channel-major chunk)
    """
    r = pl.program_id(1)
    row0 = r * th                       # first output row of this chunk
    p = th * wo                         # pixels in this chunk
    n = 4 * cout

    # ---- in-kernel im2col: one small bf16 MXU dot per conv tap, f32 accumulate.
    # Output pixel (ho, wo), input tap (di, dj) reads the phase-split input at
    # phase (di%sh)*sw + dj%sw, position (ho + di//sh, wo + dj//sw).
    gates = jnp.zeros((p, n), jnp.float32)
    for di in range(kh):
        for dj in range(kw):
            t = di * kw + dj
            phase = (di % sh) * sw + (dj % sw)
            xt = x_ref[phase,
                       pl.ds(row0 + di // sh, th),
                       pl.ds(dj // sw, wo), :]                  # (th, wo, Cin_p)
            gates += jnp.dot(xt.reshape(p, xt.shape[-1]), wi_ref[t],
                             preferred_element_type=jnp.float32)
    for di in range(khh):
        for dj in range(kwh):
            t = di * kwh + dj
            ht = h_ref[0, pl.ds(row0 + di, th), pl.ds(dj, wo), :]  # (th, wo, Cout)
            gates += jnp.dot(ht.reshape(p, cout), wh_ref[t],
                             preferred_element_type=jnp.float32)

    # ---- gate nonlinearities (f32).  i/f/o weight columns were pre-scaled by
    # 0.5 in the wrapper, so sigmoid(s) = 0.5*tanh(s/2) + 0.5 becomes a single
    # tanh over all 4*Cout lanes plus ONE full-width (128-lane) affine.
    tg = jnp.tanh(gates)
    lane = lax.broadcasted_iota(jnp.int32, (1, n), 1)
    is_sig = lane < 3 * cout
    g = tg * jnp.where(is_sig, 0.5, 1.0) + jnp.where(is_sig, 0.5, 0.0)

    # ---- state update in channel-major (Cout, pixels): one transpose on the
    # XLU (which has slack), then the c input and the h/c stores are already in
    # the NCHW-flat layout the wrapper returns (no post-kernel transposes).
    gt = g.T                                  # (4*Cout, p)
    i_g = gt[0 * cout:1 * cout, :]
    f_g = gt[1 * cout:2 * cout, :]
    o_g = gt[2 * cout:3 * cout, :]
    cand = gt[3 * cout:4 * cout, :]

    c_prev = c_ref[0]                         # (Cout, p) f32
    c_new = f_g * c_prev + i_g * cand
    h_new = o_g * jnp.tanh(c_new)

    oh_ref[0] = h_new.astype(oh_ref.dtype)    # write halves directly into refs
    oc_ref[0] = c_new.astype(oc_ref.dtype)


# ---------------------------------------------------------------------------
# Layout glue (no compute): padding + stride-phase split, weight reshapes
# ---------------------------------------------------------------------------
def _pad_and_phase_split(x_nhwc, k, s, pad, out_hw):
    """Pad spatially and split into s_h*s_w stride phases.

    Returns ((B*s_h*s_w, Hq, Wq, C), Hq, Wq) with
      result[b*n_phase + p*s_w + q, i, j, :] = x_padded[b, i*s_h + p, j*s_w + q, :]
    so that output pixel (ho, wo) under tap (di, dj) reads
      phase (di % s_h)*s_w + (dj % s_w) at (ho + di//s_h, wo + dj//s_w).
    Same total byte count as the padded input (no im2col expansion).
    """
    (kh, kw), (sh, sw), (ph, pw), (Ho, Wo) = k, s, pad, out_hw
    B, H, W, C = x_nhwc.shape
    Hq = max(Ho + (kh - 1) // sh, _cdiv(H + 2 * ph, sh))
    Wq = max(Wo + (kw - 1) // sw, _cdiv(W + 2 * pw, sw))
    xp = jnp.pad(x_nhwc, ((0, 0),
                          (ph, sh * Hq - H - ph),
                          (pw, sw * Wq - W - pw),
                          (0, 0)))
    xp = xp.reshape(B, Hq, sh, Wq, sw, C)
    xp = jnp.transpose(xp, (0, 2, 4, 1, 3, 5))        # (B, sh, sw, Hq, Wq, C)
    return xp.reshape(B * sh * sw, Hq, Wq, C), Hq, Wq


def rnn_conv_forward(inputs_nchw, hidden, wi, wh, *, stride, kernel_size,
                     hidden_kernel_size):
    """inputs: (B, Cin, H, W); hidden = (h0, c0) each (B, Cout, Ho, Wo);
    wi: (4*Cout, Cin, kh, kw); wh: (4*Cout, Cout, khh, kwh).  No bias
    (the PyTorch module uses bias=False for both convs)."""
    h0, c0 = hidden
    if isinstance(stride, int):
        stride = (stride, stride)
    if isinstance(kernel_size, int):
        kernel_size = (kernel_size, kernel_size)
    if isinstance(hidden_kernel_size, int):
        hidden_kernel_size = (hidden_kernel_size, hidden_kernel_size)

    B, Cin, H, W = inputs_nchw.shape
    Cout = h0.shape[1]
    kh, kw = kernel_size
    khh, kwh = hidden_kernel_size
    sh, sw = stride
    pH, pW = custom_padding(kernel_size)
    pHh, pWh = custom_padding(hidden_kernel_size)

    Ho = (H + 2 * pH - kh) // sh + 1
    Wo = (W + 2 * pW - kw) // sw + 1
    assert h0.shape == (B, Cout, Ho, Wo) and c0.shape == (B, Cout, Ho, Wo)

    N = 4 * Cout
    Cin_p = _round_up(Cin, 8)          # safe sublane/K granularity for the MXU
    n_phase = sh * sw

    # Matmul operands (x, h, weights) go to bf16; all gate/state math stays f32.
    x_nhwc = jnp.transpose(inputs_nchw, (0, 2, 3, 1)).astype(jnp.bfloat16)
    x_nhwc = jnp.pad(x_nhwc, ((0, 0), (0, 0), (0, 0), (0, Cin_p - Cin)))
    x_ph, Hq, Wq = _pad_and_phase_split(
        x_nhwc, (kh, kw), (sh, sw), (pH, pW), (Ho, Wo))

    h_nhwc = jnp.transpose(h0, (0, 2, 3, 1)).astype(jnp.bfloat16)
    h_ph, Hqh, Wqh = _pad_and_phase_split(
        h_nhwc, (khh, kwh), (1, 1), (pHh, pWh), (Ho, Wo))

    # Previous cell state: NCHW is already channel-major -> free reshape, f32.
    c_cm = c0.reshape(B, Cout, Ho * Wo).astype(jnp.float32)

    # Weights: OIHW -> (tap, Cin, 4*Cout).  Fold the 0.5 argument scale of
    # sigmoid(x) = 0.5*tanh(x/2) + 0.5 into the i/f/o columns (exact).
    gate_scale = jnp.concatenate([jnp.full((3 * Cout,), 0.5, jnp.float32),
                                  jnp.ones((Cout,), jnp.float32)])
    wi_t = jnp.transpose(wi, (2, 3, 1, 0)).reshape(kh * kw, Cin, N)
    wi_t = jnp.pad(wi_t, ((0, 0), (0, Cin_p - Cin), (0, 0)))
    wi_t = (wi_t * gate_scale).astype(jnp.bfloat16)
    wh_t = jnp.transpose(wh, (2, 3, 1, 0)).reshape(khh * kwh, Cout, N)
    wh_t = (wh_t * gate_scale).astype(jnp.bfloat16)

    # Tiling: whole phase-split images stay VMEM-resident per batch element
    # (their block index ignores the chunk axis, so they are DMA'd once per
    # batch); the second grid axis walks chunks of TH output rows.
    TH = _choose_row_chunk(Ho, Wo, Cout)
    NC = Ho // TH
    P_chunk = TH * Wo

    # Derive the VMEM limit from the actual block sizes (review item), with
    # headroom for Mosaic scratch.  Total grid = B*NC steps; on v7x an odd step
    # count leaves one TensorCore idle for one step (accepted: padding the
    # batch would cost real work on single-core v5e/v6e).
    blk_bytes = (
        2 * n_phase * Hq * Wq * Cin_p * 2          # x (double-buffered)
        + 2 * Hqh * Wqh * Cout * 2                 # h (double-buffered)
        + 2 * Cout * P_chunk * 4                   # c (double-buffered)
        + 2 * 2 * Cout * P_chunk * 4               # h/c outputs (double-buffered)
        + 2 * (kh * kw * Cin_p + khh * kwh * Cout) * N * 2   # weights
        + 4 * P_chunk * N * 4                      # gates + transposed temps
    )
    vmem_limit = int(min(96 * 2**20, max(16 * 2**20, 2 * blk_bytes)))

    M = B * Ho * Wo
    cost = pl.CostEstimate(
        flops=2 * M * (kh * kw * Cin_p + khh * kwh * Cout) * N + 10 * M * Cout,
        transcendentals=5 * M * Cout,
        bytes_accessed=int(x_ph.size * 2 + h_ph.size * 2 + c_cm.size * 4
                           + 2 * M * Cout * 4 + (wi_t.size + wh_t.size) * 2),
    )

    kernel = functools.partial(
        _rnn_conv_kernel, sh=sh, sw=sw, kh=kh, kw=kw, khh=khh, kwh=kwh,
        th=TH, wo=Wo, cout=Cout)

    # NOTE (review "Buffered(1) for weights"): their block index is constant
    # across the whole grid, so Pallas DMAs them only once; the remaining cost
    # is the unused second VMEM buffer (K*N*2 bytes), negligible at these
    # sizes.  TODO(synk): pipeline_mode=pl.Buffered(1) when K*Cout gets large.
    out_h, out_c = pl.pallas_call(
        kernel,
        out_shape=(jax.ShapeDtypeStruct((B, Cout, Ho * Wo), jnp.float32),
                   jax.ShapeDtypeStruct((B, Cout, Ho * Wo), jnp.float32)),
        grid_spec=pltpu.PrefetchScalarGridSpec(
            num_scalar_prefetch=0,
            grid=(B, NC),
            in_specs=[
                pl.BlockSpec((n_phase, Hq, Wq, Cin_p), lambda b, r: (b, 0, 0, 0)),
                pl.BlockSpec((1, Hqh, Wqh, Cout), lambda b, r: (b, 0, 0, 0)),
                pl.BlockSpec((1, Cout, P_chunk), lambda b, r: (b, 0, r)),
                pl.BlockSpec((kh * kw, Cin_p, N), lambda b, r: (0, 0, 0)),
                pl.BlockSpec((khh * kwh, Cout, N), lambda b, r: (0, 0, 0)),
            ],
            out_specs=[
                pl.BlockSpec((1, Cout, P_chunk), lambda b, r: (b, 0, r)),
                pl.BlockSpec((1, Cout, P_chunk), lambda b, r: (b, 0, r)),
            ],
        ),
        compiler_params=pltpu.CompilerParams(
            dimension_semantics=("parallel", "parallel"),
            vmem_limit_bytes=vmem_limit,
        ),
        cost_estimate=cost,
    )(x_ph, h_ph, c_cm, wi_t, wh_t)

    # Outputs are already channel-major: only free reshapes, no transposes.
    new_h = out_h.reshape(B, Cout, Ho, Wo)
    new_c = out_c.reshape(B, Cout, Ho, Wo)
    return new_h, new_c


# ---------------------------------------------------------------------------
# Pure-JAX reference (mirrors the PyTorch forward exactly), for verification
# ---------------------------------------------------------------------------
def rnn_conv_reference(inputs, hidden, wi, wh, *, stride, kernel_size,
                       hidden_kernel_size):
    h0, c0 = hidden
    dn = ('NCHW', 'OIHW', 'NCHW')
    pH, pW = custom_padding(kernel_size)
    pHh, pWh = custom_padding(hidden_kernel_size)
    conv_inputs = lax.conv_general_dilated(inputs, wi, stride,
                                           [(pH, pH), (pW, pW)],
                                           dimension_numbers=dn)
    conv_hidden = lax.conv_general_dilated(h0, wh, (1, 1),
                                           [(pHh, pHh), (pWh, pWh)],
                                           dimension_numbers=dn)
    s = conv_inputs + conv_hidden
    i_g, f_g, o_g, g_g = jnp.split(s, 4, axis=1)
    i_g = jax.nn.sigmoid(i_g)
    f_g = jax.nn.sigmoid(f_g)
    o_g = jax.nn.sigmoid(o_g)
    g_g = jnp.tanh(g_g)
    new_c = f_g * c0 + i_g * g_g
    new_h = o_g * jnp.tanh(new_c)
    return new_h, new_c


if __name__ == "__main__":
    # Small, module-consistent shapes (paper-style encoder cell:
    # 3x3 stride-2 input conv, 1x1 hidden conv).
    B, Cin, H, W = 2, 4, 16, 16
    Cout = 32
    kernel_size = (3, 3)
    hidden_kernel_size = (1, 1)
    stride = (2, 2)
    pH, pW = custom_padding(kernel_size)
    Ho = (H + 2 * pH - kernel_size[0]) // stride[0] + 1
    Wo = (W + 2 * pW - kernel_size[1]) // stride[1] + 1

    key = jax.random.PRNGKey(0)
    kx, kh_, kc, kwi, kwh = jax.random.split(key, 5)

    x = jax.random.normal(kx, (B, Cin, H, W), dtype=jnp.float32)
    h0 = jax.random.normal(kh_, (B, Cout, Ho, Wo), dtype=jnp.float32) * 0.1
    c0 = jax.random.normal(kc, (B, Cout, Ho, Wo), dtype=jnp.float32) * 0.1

    # Deterministic synthetic conv weights (PyTorch OIHW layout, bias=False).
    wi = jax.random.normal(kwi, (4 * Cout, Cin) + kernel_size, jnp.float32) * 0.1
    wh = jax.random.normal(kwh, (4 * Cout, Cout) + hidden_kernel_size,
                           jnp.float32) * 0.1

    new_h, new_c = rnn_conv_forward(
        x, (h0, c0), wi, wh,
        stride=stride, kernel_size=kernel_size,
        hidden_kernel_size=hidden_kernel_size)
    jax.block_until_ready((new_h, new_c))

    ref_h, ref_c = rnn_conv_reference(
        x, (h0, c0), wi, wh,
        stride=stride, kernel_size=kernel_size,
        hidden_kernel_size=hidden_kernel_size)

    assert new_h.shape == (B, Cout, Ho, Wo) and new_c.shape == (B, Cout, Ho, Wo)
    # bf16 matmul operands -> relaxed (but still meaningful) tolerances.
    assert jnp.allclose(new_h, ref_h, atol=3e-2, rtol=3e-2)
    assert jnp.allclose(new_c, ref_c, atol=3e-2, rtol=3e-2)

    print("KERNEL_OK")
</pallas_src>

<mosaic_0001>
module attributes {stable_mosaic.version = 11 : i64} {
  func.func @_rnn_conv_kernel(%arg0: i32, %arg1: i32, %arg2: memref<4x9x9x8xbf16, #tpu.memory_space<vmem>>, %arg3: memref<1x8x8x32xbf16, #tpu.memory_space<vmem>>, %arg4: memref<1x32x64xf32, #tpu.memory_space<vmem>>, %arg5: memref<9x8x128xbf16, #tpu.memory_space<vmem>>, %arg6: memref<1x32x128xbf16, #tpu.memory_space<vmem>>, %arg7: memref<1x32x64xf32, #tpu.memory_space<vmem>>, %arg8: memref<1x32x64xf32, #tpu.memory_space<vmem>>) attributes {dimension_semantics = [#tpu.dimension_semantics<parallel>, #tpu.dimension_semantics<parallel>], iteration_bounds = array<i64: 2, 1>, scalar_prefetch = 0 : i64, scratch_operands = 0 : i64, tpu.core_type = #tpu.core_type<tc>, window_params = [{transform_indices = @transform_0, window_bounds = array<i64: 4, 9, 9, 8>}, {transform_indices = @transform_1, window_bounds = array<i64: 1, 8, 8, 32>}, {transform_indices = @transform_2, window_bounds = array<i64: 1, 32, 64>}, {pipeline_mode = #tpu.pipeline_mode<synchronous>, transform_indices = @transform_3, window_bounds = array<i64: 9, 8, 128>}, {pipeline_mode = #tpu.pipeline_mode<synchronous>, transform_indices = @transform_4, window_bounds = array<i64: 1, 32, 128>}, {transform_indices = @transform_5, window_bounds = array<i64: 1, 32, 64>}, {transform_indices = @transform_6, window_bounds = array<i64: 1, 32, 64>}]} {
    %c8_i32 = arith.constant 8 : i32
    %0 = arith.muli %arg1, %c8_i32 : i32
    %cst = arith.constant 0.000000e+00 : f32
    %1 = vector.broadcast %cst : f32 to vector<64x128xf32>
    %c0_i32 = arith.constant 0 : i32
    %2 = arith.addi %0, %c0_i32 : i32
    %c0 = arith.constant 0 : index
    %3 = arith.index_cast %2 : i32 to index
    %c0_0 = arith.constant 0 : index
    %c0_1 = arith.constant 0 : index
    %4 = vector.load %arg2[%c0, %3, %c0_0, %c0_1] : memref<4x9x9x8xbf16, #tpu.memory_space<vmem>>, vector<1x8x8x8xbf16>
    %5 = vector.shape_cast %4 : vector<1x8x8x8xbf16> to vector<8x8x8xbf16>
    %6 = vector.shape_cast %5 : vector<8x8x8xbf16> to vector<64x8xbf16>
    %c0_2 = arith.constant 0 : index
    %c0_3 = arith.constant 0 : index
    %c0_4 = arith.constant 0 : index
    %7 = vector.load %arg5[%c0_2, %c0_3, %c0_4] : memref<9x8x128xbf16, #tpu.memory_space<vmem>>, vector<1x8x128xbf16>
    %8 = vector.shape_cast %7 : vector<1x8x128xbf16> to vector<8x128xbf16>
    %cst_5 = arith.constant dense<0.000000e+00> : vector<64x128xf32>
    %9 = tpu.matmul %6, %8, %cst_5 {dimension_numbers = #tpu.dot_dimension_numbers<[1], [0], [0], [1], [0, 0, 1, 1], [], []>} : vector<64x8xbf16>, vector<8x128xbf16>, vector<64x128xf32> -> vector<64x128xf32>
    %10 = arith.addf %1, %9 : vector<64x128xf32>
    %c0_i32_6 = arith.constant 0 : i32
    %11 = arith.addi %0, %c0_i32_6 : i32
    %c1 = arith.constant 1 : index
    %12 = arith.index_cast %11 : i32 to index
    %c0_7 = arith.constant 0 : index
    %c0_8 = arith.constant 0 : index
    %13 = vector.load %arg2[%c1, %12, %c0_7, %c0_8] : memref<4x9x9x8xbf16, #tpu.memory_space<vmem>>, vector<1x8x8x8xbf16>
    %14 = vector.shape_cast %13 : vector<1x8x8x8xbf16> to vector<8x8x8xbf16>
    %15 = vector.shape_cast %14 : vector<8x8x8xbf16> to vector<64x8xbf16>
    %c1_9 = arith.constant 1 : index
    %c0_10 = arith.constant 0 : index
    %c0_11 = arith.constant 0 : index
    %16 = vector.load %arg5[%c1_9, %c0_10, %c0_11] : memref<9x8x128xbf16, #tpu.memory_space<vmem>>, vector<1x8x128xbf16>
    %17 = vector.shape_cast %16 : vector<1x8x128xbf16> to vector<8x128xbf16>
    %cst_12 = arith.constant dense<0.000000e+00> : vector<64x128xf32>
    %18 = tpu.matmul %15, %17, %cst_12 {dimension_numbers = #tpu.dot_dimension_numbers<[1], [0], [0], [1], [0, 0, 1, 1], [], []>} : vector<64x8xbf16>, vector<8x128xbf16>, vector<64x128xf32> -> vector<64x128xf32>
    %19 = arith.addf %10, %18 : vector<64x128xf32>
    %c0_i32_13 = arith.constant 0 : i32
    %20 = arith.addi %0, %c0_i32_13 : i32
    %c0_14 = arith.constant 0 : index
    %21 = arith.index_cast %20 : i32 to index
    %c1_15 = arith.constant 1 : index
    %c0_16 = arith.constant 0 : index
    %22 = vector.load %arg2[%c0_14, %21, %c1_15, %c0_16] : memref<4x9x9x8xbf16, #tpu.memory_space<vmem>>, vector<1x8x8x8xbf16>
    %23 = vector.shape_cast %22 : vector<1x8x8x8xbf16> to vector<8x8x8xbf16>
    %24 = vector.shape_cast %23 : vector<8x8x8xbf16> to vector<64x8xbf16>
    %c2 = arith.constant 2 : index
    %c0_17 = arith.constant 0 : index
    %c0_18 = arith.constant 0 : index
    %25 = vector.load %arg5[%c2, %c0_17, %c0_18] : memref<9x8x128xbf16, #tpu.memory_space<vmem>>, vector<1x8x128xbf16>
    %26 = vector.shape_cast %25 : vector<1x8x128xbf16> to vector<8x128xbf16>
    %cst_19 = arith.constant dense<0.000000e+00> : vector<64x128xf32>
    %27 = tpu.matmul %24, %26, %cst_19 {dimension_numbers = #tpu.dot_dimension_numbers<[1], [0], [0], [1], [0, 0, 1, 1], [], []>} : vector<64x8xbf16>, vector<8x128xbf16>, vector<64x128xf32> -> vector<64x128xf32>
    %28 = arith.addf %19, %27 : vector<64x128xf32>
    %c0_i32_20 = arith.constant 0 : i32
    %29 = arith.addi %0, %c0_i32_20 : i32
    %c2_21 = arith.constant 2 : index
    %30 = arith.index_cast %29 : i32 to index
    %c0_22 = arith.constant 0 : index
    %c0_23 = arith.constant 0 : index
    %31 = vector.load %arg2[%c2_21, %30, %c0_22, %c0_23] : memref<4x9x9x8xbf16, #tpu.memory_space<vmem>>, vector<1x8x8x8xbf16>
    %32 = vector.shape_cast %31 : vector<1x8x8x8xbf16> to vector<8x8x8xbf16>
    %33 = vector.shape_cast %32 : vector<8x8x8xbf16> to vector<64x8xbf16>
    %c3 = arith.constant 3 : index
    %c0_24 = arith.constant 0 : index
    %c0_25 = arith.constant 0 : index
    %34 = vector.load %arg5[%c3, %c0_24, %c0_25] : memref<9x8x128xbf16, #tpu.memory_space<vmem>>, vector<1x8x128xbf16>
    %35 = vector.shape_cast %34 : vector<1x8x128xbf16> to vector<8x128xbf16>
    %cst_26 = arith.constant dense<0.000000e+00> : vector<64x128xf32>
    %36 = tpu.matmul %33, %35, %cst_26 {dimension_numbers = #tpu.dot_dimension_numbers<[1], [0], [0], [1], [0, 0, 1, 1], [], []>} : vector<64x8xbf16>, vector<8x128xbf16>, vector<64x128xf32> -> vector<64x128xf32>
    %37 = arith.addf %28, %36 : vector<64x128xf32>
    %c0_i32_27 = arith.constant 0 : i32
    %38 = arith.addi %0, %c0_i32_27 : i32
    %c3_28 = arith.constant 3 : index
    %39 = arith.index_cast %38 : i32 to index
    %c0_29 = arith.constant 0 : index
    %c0_30 = arith.constant 0 : index
    %40 = vector.load %arg2[%c3_28, %39, %c0_29, %c0_30] : memref<4x9x9x8xbf16, #tpu.memory_space<vmem>>, vector<1x8x8x8xbf16>
    %41 = vector.shape_cast %40 : vector<1x8x8x8xbf16> to vector<8x8x8xbf16>
    %42 = vector.shape_cast %41 : vector<8x8x8xbf16> to vector<64x8xbf16>
    %c4 = arith.constant 4 : index
    %c0_31 = arith.constant 0 : index
    %c0_32 = arith.constant 0 : index
    %43 = vector.load %arg5[%c4, %c0_31, %c0_32] : memref<9x8x128xbf16, #tpu.memory_space<vmem>>, vector<1x8x128xbf16>
    %44 = vector.shape_cast %43 : vector<1x8x128xbf16> to vector<8x128xbf16>
    %cst_33 = arith.constant dense<0.000000e+00> : vector<64x128xf32>
    %45 = tpu.matmul %42, %44, %cst_33 {dimension_numbers = #tpu.dot_dimension_numbers<[1], [0], [0], [1], [0, 0, 1, 1], [], []>} : vector<64x8xbf16>, vector<8x128xbf16>, vector<64x128xf32> -> vector<64x128xf32>
    %46 = arith.addf %37, %45 : vector<64x128xf32>
    %c0_i32_34 = arith.constant 0 : i32
    %47 = arith.addi %0, %c0_i32_34 : i32
    %c2_35 = arith.constant 2 : index
    %48 = arith.index_cast %47 : i32 to index
    %c1_36 = arith.constant 1 : index
    %c0_37 = arith.constant 0 : index
    %49 = vector.load %arg2[%c2_35, %48, %c1_36, %c0_37] : memref<4x9x9x8xbf16, #tpu.memory_space<vmem>>, vector<1x8x8x8xbf16>
    %50 = vector.shape_cast %49 : vector<1x8x8x8xbf16> to vector<8x8x8xbf16>
    %51 = vector.shape_cast %50 : vector<8x8x8xbf16> to vector<64x8xbf16>
    %c5 = arith.constant 5 : index
    %c0_38 = arith.constant 0 : index
    %c0_39 = arith.constant 0 : index
    %52 = vector.load %arg5[%c5, %c0_38, %c0_39] : memref<9x8x128xbf16, #tpu.memory_space<vmem>>, vector<1x8x128xbf16>
    %53 = vector.shape_cast %52 : vector<1x8x128xbf16> to vector<8x128xbf16>
    %cst_40 = arith.constant dense<0.000000e+00> : vector<64x128xf32>
    %54 = tpu.matmul %51, %53, %cst_40 {dimension_numbers = #tpu.dot_dimension_numbers<[1], [0], [0], [1], [0, 0, 1, 1], [], []>} : vector<64x8xbf16>, vector<8x128xbf16>, vector<64x128xf32> -> vector<64x128xf32>
    %55 = arith.addf %46, %54 : vector<64x128xf32>
    %c1_i32 = arith.constant 1 : i32
    %56 = arith.addi %0, %c1_i32 : i32
    %c0_41 = arith.constant 0 : index
    %57 = arith.index_cast %56 : i32 to index
    %c0_42 = arith.constant 0 : index
    %c0_43 = arith.constant 0 : index
    %58 = vector.load %arg2[%c0_41, %57, %c0_42, %c0_43] : memref<4x9x9x8xbf16, #tpu.memory_space<vmem>>, vector<1x8x8x8xbf16>
    %59 = vector.shape_cast %58 : vector<1x8x8x8xbf16> to vector<8x8x8xbf16>
    %60 = vector.shape_cast %59 : vector<8x8x8xbf16> to vector<64x8xbf16>
    %c6 = arith.constant 6 : index
    %c0_44 = arith.constant 0 : index
    %c0_45 = arith.constant 0 : index
    %61 = vector.load %arg5[%c6, %c0_44, %c0_45] : memref<9x8x128xbf16, #tpu.memory_space<vmem>>, vector<1x8x128xbf16>
    %62 = vector.shape_cast %61 : vector<1x8x128xbf16> to vector<8x128xbf16>
    %cst_46 = arith.constant dense<0.000000e+00> : vector<64x128xf32>
    %63 = tpu.matmul %60, %62, %cst_46 {dimension_numbers = #tpu.dot_dimension_numbers<[1], [0], [0], [1], [0, 0, 1, 1], [], []>} : vector<64x8xbf16>, vector<8x128xbf16>, vector<64x128xf32> -> vector<64x128xf32>
    %64 = arith.addf %55, %63 : vector<64x128xf32>
    %c1_i32_47 = arith.constant 1 : i32
    %65 = arith.addi %0, %c1_i32_47 : i32
    %c1_48 = arith.constant 1 : index
    %66 = arith.index_cast %65 : i32 to index
    %c0_49 = arith.constant 0 : index
    %c0_50 = arith.constant 0 : index
    %67 = vector.load %arg2[%c1_48, %66, %c0_49, %c0_50] : memref<4x9x9x8xbf16, #tpu.memory_space<vmem>>, vector<1x8x8x8xbf16>
    %68 = vector.shape_cast %67 : vector<1x8x8x8xbf16> to vector<8x8x8xbf16>
    %69 = vector.shape_cast %68 : vector<8x8x8xbf16> to vector<64x8xbf16>
    %c7 = arith.constant 7 : index
    %c0_51 = arith.constant 0 : index
    %c0_52 = arith.constant 0 : index
    %70 = vector.load %arg5[%c7, %c0_51, %c0_52] : memref<9x8x128xbf16, #tpu.memory_space<vmem>>, vector<1x8x128xbf16>
    %71 = vector.shape_cast %70 : vector<1x8x128xbf16> to vector<8x128xbf16>
    %cst_53 = arith.constant dense<0.000000e+00> : vector<64x128xf32>
    %72 = tpu.matmul %69, %71, %cst_53 {dimension_numbers = #tpu.dot_dimension_numbers<[1], [0], [0], [1], [0, 0, 1, 1], [], []>} : vector<64x8xbf16>, vector<8x128xbf16>, vector<64x128xf32> -> vector<64x128xf32>
    %73 = arith.addf %64, %72 : vector<64x128xf32>
    %c1_i32_54 = arith.constant 1 : i32
    %74 = arith.addi %0, %c1_i32_54 : i32
    %c0_55 = arith.constant 0 : index
    %75 = arith.index_cast %74 : i32 to index
    %c1_56 = arith.constant 1 : index
    %c0_57 = arith.constant 0 : index
    %76 = vector.load %arg2[%c0_55, %75, %c1_56, %c0_57] : memref<4x9x9x8xbf16, #tpu.memory_space<vmem>>, vector<1x8x8x8xbf16>
    %77 = vector.shape_cast %76 : vector<1x8x8x8xbf16> to vector<8x8x8xbf16>
    %78 = vector.shape_cast %77 : vector<8x8x8xbf16> to vector<64x8xbf16>
    %c8 = arith.constant 8 : index
    %c0_58 = arith.constant 0 : index
    %c0_59 = arith.constant 0 : index
    %79 = vector.load %arg5[%c8, %c0_58, %c0_59] : memref<9x8x128xbf16, #tpu.memory_space<vmem>>, vector<1x8x128xbf16>
    %80 = vector.shape_cast %79 : vector<1x8x128xbf16> to vector<8x128xbf16>
    %cst_60 = arith.constant dense<0.000000e+00> : vector<64x128xf32>
    %81 = tpu.matmul %78, %80, %cst_60 {dimension_numbers = #tpu.dot_dimension_numbers<[1], [0], [0], [1], [0, 0, 1, 1], [], []>} : vector<64x8xbf16>, vector<8x128xbf16>, vector<64x128xf32> -> vector<64x128xf32>
    %82 = arith.addf %73, %81 : vector<64x128xf32>
    %c0_i32_61 = arith.constant 0 : i32
    %83 = arith.addi %0, %c0_i32_61 : i32
    %c0_62 = arith.constant 0 : index
    %84 = arith.index_cast %83 : i32 to index
    %c0_63 = arith.constant 0 : index
    %c0_64 = arith.constant 0 : index
    %85 = vector.load %arg3[%c0_62, %84, %c0_63, %c0_64] : memref<1x8x8x32xbf16, #tpu.memory_space<vmem>>, vector<1x8x8x32xbf16>
    %86 = vector.shape_cast %85 : vector<1x8x8x32xbf16> to vector<8x8x32xbf16>
    %87 = vector.shape_cast %86 : vector<8x8x32xbf16> to vector<64x32xbf16>
    %c0_65 = arith.constant 0 : index
    %c0_66 = arith.constant 0 : index
    %c0_67 = arith.constant 0 : index
    %88 = vector.load %arg6[%c0_65, %c0_66, %c0_67] : memref<1x32x128xbf16, #tpu.memory_space<vmem>>, vector<1x32x128xbf16>
    %89 = vector.shape_cast %88 : vector<1x32x128xbf16> to vector<32x128xbf16>
    %cst_68 = arith.constant dense<0.000000e+00> : vector<64x128xf32>
    %90 = tpu.matmul %87, %89, %cst_68 {dimension_numbers = #tpu.dot_dimension_numbers<[1], [0], [0], [1], [0, 0, 1, 1], [], []>} : vector<64x32xbf16>, vector<32x128xbf16>, vector<64x128xf32> -> vector<64x128xf32>
    %91 = arith.addf %82, %90 : vector<64x128xf32>
    %92 = math.tanh %91 : vector<64x128xf32>
    %93 = tpu.iota {dimensions = array<i32: 1>} : vector<1x128xi32>
    %c96_i32 = arith.constant 96 : i32
    %94 = vector.broadcast %c96_i32 : i32 to vector<1x128xi32>
    %95 = arith.cmpi slt, %93, %94 : vector<1x128xi32>
    %cst_69 = arith.constant 5.000000e-01 : f32
    %cst_70 = arith.constant 1.000000e+00 : f32
    %96 = vector.broadcast %cst_69 : f32 to vector<1x128xf32>
    %97 = vector.broadcast %cst_70 : f32 to vector<1x128xf32>
    %98 = arith.select %95, %96, %97 : vector<1x128xi1>, vector<1x128xf32>
    %99 = vector.broadcast %98 : vector<1x128xf32> to vector<64x128xf32>
    %100 = arith.mulf %92, %99 : vector<64x128xf32>
    %cst_71 = arith.constant 5.000000e-01 : f32
    %cst_72 = arith.constant 0.000000e+00 : f32
    %101 = vector.broadcast %cst_71 : f32 to vector<1x128xf32>
    %102 = vector.broadcast %cst_72 : f32 to vector<1x128xf32>
    %103 = arith.select %95, %101, %102 : vector<1x128xi1>, vector<1x128xf32>
    %104 = vector.broadcast %103 : vector<1x128xf32> to vector<64x128xf32>
    %105 = arith.addf %100, %104 : vector<64x128xf32>
    %106 = tpu.transpose %105, [1, 0] : vector<64x128xf32> -> vector<128x64xf32>
    %107 = vector.extract_strided_slice %106 {offsets = [0, 0], sizes = [32, 64], strides = [1, 1]} : vector<128x64xf32> to vector<32x64xf32>
    %108 = vector.extract_strided_slice %106 {offsets = [32, 0], sizes = [32, 64], strides = [1, 1]} : vector<128x64xf32> to vector<32x64xf32>
    %109 = vector.extract_strided_slice %106 {offsets = [64, 0], sizes = [32, 64], strides = [1, 1]} : vector<128x64xf32> to vector<32x64xf32>
    %110 = vector.extract_strided_slice %106 {offsets = [96, 0], sizes = [32, 64], strides = [1, 1]} : vector<128x64xf32> to vector<32x64xf32>
    %c0_73 = arith.constant 0 : index
    %c0_74 = arith.constant 0 : index
    %c0_75 = arith.constant 0 : index
    %111 = vector.load %arg4[%c0_73, %c0_74, %c0_75] : memref<1x32x64xf32, #tpu.memory_space<vmem>>, vector<1x32x64xf32>
    %112 = vector.shape_cast %111 : vector<1x32x64xf32> to vector<32x64xf32>
    %113 = arith.mulf %108, %112 : vector<32x64xf32>
    %114 = arith.mulf %107, %110 : vector<32x64xf32>
    %115 = arith.addf %113, %114 : vector<32x64xf32>
    %116 = math.tanh %115 : vector<32x64xf32>
    %117 = arith.mulf %109, %116 : vector<32x64xf32>
    %c0_76 = arith.constant 0 : index
    %c0_77 = arith.constant 0 : index
    %c0_78 = arith.constant 0 : index
    %118 = vector.load %arg7[%c0_76, %c0_77, %c0_78] : memref<1x32x64xf32, #tpu.memory_space<vmem>>, vector<1x32x64xf32>
    %119 = vector.shape_cast %118 : vector<1x32x64xf32> to vector<32x64xf32>
    %120 = vector.shape_cast %117 : vector<32x64xf32> to vector<1x32x64xf32>
    tpu.vector_store %arg7[%c0_76, %c0_77, %c0_78], %120 {strides = array<i32>} : memref<1x32x64xf32, #tpu.memory_space<vmem>>, vector<1x32x64xf32>,
    %c0_79 = arith.constant 0 : index
    %c0_80 = arith.constant 0 : index
    %c0_81 = arith.constant 0 : index
    %121 = vector.load %arg8[%c0_79, %c0_80, %c0_81] : memref<1x32x64xf32, #tpu.memory_space<vmem>>, vector<1x32x64xf32>
    %122 = vector.shape_cast %121 : vector<1x32x64xf32> to vector<32x64xf32>
    %123 = vector.shape_cast %115 : vector<32x64xf32> to vector<1x32x64xf32>
    tpu.vector_store %arg8[%c0_79, %c0_80, %c0_81], %123 {strides = array<i32>} : memref<1x32x64xf32, #tpu.memory_space<vmem>>, vector<1x32x64xf32>,
    return
  }
  func.func @transform_0(%arg0: i32, %arg1: i32) -> (i32, i32, i32, i32) {
    %c0_i32 = arith.constant 0 : i32
    %c0_i32_0 = arith.constant 0 : i32
    %c0_i32_1 = arith.constant 0 : i32
    %c0_i32_2 = arith.constant 0 : i32
    return %arg0, %c0_i32, %c0_i32_0, %c0_i32_1 : i32, i32, i32, i32
  }
  func.func @transform_1(%arg0: i32, %arg1: i32) -> (i32, i32, i32, i32) {
    %c0_i32 = arith.constant 0 : i32
    %c0_i32_0 = arith.constant 0 : i32
    %c0_i32_1 = arith.constant 0 : i32
    %c0_i32_2 = arith.constant 0 : i32
    return %arg0, %c0_i32, %c0_i32_0, %c0_i32_1 : i32, i32, i32, i32
  }
  func.func @transform_2(%arg0: i32, %arg1: i32) -> (i32, i32, i32) {
    %c0_i32 = arith.constant 0 : i32
    %c0_i32_0 = arith.constant 0 : i32
    return %arg0, %c0_i32, %arg1 : i32, i32, i32
  }
  func.func @transform_3(%arg0: i32, %arg1: i32) -> (i32, i32, i32) {
    %c0_i32 = arith.constant 0 : i32
    %c0_i32_0 = arith.constant 0 : i32
    %c0_i32_1 = arith.constant 0 : i32
    %c0_i32_2 = arith.constant 0 : i32
    return %c0_i32, %c0_i32_0, %c0_i32_1 : i32, i32, i32
  }
  func.func @transform_4(%arg0: i32, %arg1: i32) -> (i32, i32, i32) {
    %c0_i32 = arith.constant 0 : i32
    %c0_i32_0 = arith.constant 0 : i32
    %c0_i32_1 = arith.constant 0 : i32
    %c0_i32_2 = arith.constant 0 : i32
    return %c0_i32, %c0_i32_0, %c0_i32_1 : i32, i32, i32
  }
  func.func @transform_5(%arg0: i32, %arg1: i32) -> (i32, i32, i32) {
    %c0_i32 = arith.constant 0 : i32
    %c0_i32_0 = arith.constant 0 : i32
    return %arg0, %c0_i32, %arg1 : i32, i32, i32
  }
  func.func @transform_6(%arg0: i32, %arg1: i32) -> (i32, i32, i32) {
    %c0_i32 = arith.constant 0 : i32
    %c0_i32_0 = arith.constant 0 : i32
    return %arg0, %c0_i32, %arg1 : i32, i32, i32
  }
}

</mosaic_0001>

<bundles_post_ra>
// kernel: tpu_custom_call.1
= control target key start
LH: loop header
LB: loop body
LE: loop exit
PB: predicated region body
PF: predicated region fallthrough
CT: control target
= control target key end

     0   :  { %12 = vsyncpa [#allocation3], 0  ;;  %s3301_s0 = inlined_call_operand.vmem [shape: bf16[8,9,9,8], index: 0, kind: input, shape index: {}]   ;;  %s3302_s1 = inlined_call_operand.vmem [shape: bf16[2,8,8,32], index: 1, kind: input, shape index: {}]   ;;  %s3303_s2 = inlined_call_operand.vmem [shape: f32[2,32,64], index: 2, kind: input, shape index: {}]   ;;  %s3304_s3 = inlined_call_operand.vmem [shape: bf16[9,8,128], index: 3, kind: input, shape index: {}]   ;;  %s3305_s4 = inlined_call_operand.vmem [shape: bf16[1,32,128], index: 4, kind: input, shape index: {}]   ;;  %s3306_s5 = inlined_call_operand.hbm [shape: f32[2,32,64], index: 5, kind: output, shape index: {0}]   ;;  %s3307_s6 = inlined_call_operand.hbm [shape: f32[2,32,64], index: 6, kind: output, shape index: {1}]  }
   0x1   :  { %14 = vsyncpa [#allocation3 + $0x1], 0 }
   0x2   :  { %15 = vsyncpa [#allocation5], 0 }
   0x3   :  { %17 = vsyncpa [#allocation5 + $0x1], 0  ;;  %s2857_s21 = smov 0   ;;  %s2859_s22 = smov 0  }
   0x4   :  { %s2861_s23 = smov 0   ;;  %s2863_s24 = smov 0  }
   0x5   :  { %s2865_s25 = smov 0   ;;  %s2867_s26 = smov 0  }
   0x6 LB: > { %s2164_s27 = sadd.s32 4294967295, %s2814_s26   ;;  %s2165_s28 = sadd.s32 4294967294, %s2814_s26   ;;  %s2814_s26 = sphi %s2867_s26, %s23_s26   ;;  %s2810_s25 = sphi %s2865_s25, %s3316_s25   ;;  %s2806_s24 = sphi %s2863_s24, %s3315_s24   ;;  %s2802_s23 = sphi %s2861_s23, %s3314_s23   ;;  %s2798_s22 = sphi %s2859_s22, %s3313_s22   ;;  %s2794_s21 = sphi %s2857_s21, %s3312_s21  }
   0x7   : > { %s35_s29 = sadd.s32 1, %s2810_s25  ;;  %s166_s30 = sadd.s32 1, %s2802_s23 }
   0x8   : > { %p37_p0 = scmp.ge.s32.totalorder %s35_s29, 2  ;;  %p176_p1 = scmp.ne.s32.totalorder %s2802_s23, %s2798_s22 }
   0x9   : > { %p177_p2 = scmp.eq.s32.totalorder %s2164_s27, 1  ;;  %p182_p3 = scmp.ne.s32.totalorder %s2798_s22, %s2794_s21 }
   0xa   : > { %s3318_s29 = smov (%p37_p0, %s35_s29), 0  ;;  %p183_p5 = scmp.eq.s32.totalorder %s2165_s28, 1 }
   0xb   : > { %p2897_p4 = por %p177_p2, %p176_p1  ;;  %s161_s8 = ssub.s32 %s2810_s25, %s3318_s29 }
   0xc   : > { %p2168_p6 = scmp.ge.s32.totalorder %s2814_s26, 1  ;;  %p164_p7 = scmp.eq.s32.totalorder %s161_s8, 0 }
   0xd   : > { %p2904_p8 = por %p183_p5, %p182_p3  ;;  %p264_p9 = scmp.lt.s32.totalorder %s2814_s26, 3 }
   0xe   : > { %s2910_s10 = scalar_select %p164_p7, %s2802_s23, %s166_s30  }
   0xf   : > { %p265_p10 = pnand %p2168_p6, %p264_p9 }
  0x10   : > { %v2185_v0 = vld [vmem:[%s3304_s3 + $0x4] sm:$0xf] (!%p265_p10)  ;;  %vm393_vm0 = vcmask (!%p265_p10), 1043456   ;;  %s2171_s13 = sshll.u32 (!%p265_p10), %s2806_s24, 2  ;;  %v2261_v2 = vld [vmem:[%s3304_s3 + $0x14] sm:$0xf] (!%p265_p10) }
  0x11   : > { %268 = sbr.rel (%p265_p10) target bundleno = 575 (0x23f), region = 40  ;;  %2576 = vmatprep.subr.msk.bf16.mxu1 (!%p265_p10), %vm393_vm0, %v2185_v0  ;;  %v395_v1 = vsel (!%p265_p10), %vm393_vm0, %v2185_v0, 0  ;;  %p314_p11 = scmp.lt.s32.totalorder (!%p265_p10), %s2171_s13, 7  ;;  %v346_v3 = vld [vmem:[%s3304_s3] sm:$0xf] (!%p265_p10)  ;;  %2581 = vmatprep.subr.msk.bf16.mxu0 (!%p265_p10), %vm393_vm0, %v2261_v2  ;;  %v1192_v4 = vsel (!%p265_p10), %vm393_vm0, %v2261_v2, 0 }
  0x12   : > { %2403 = vmatpush3.bf16.msra.mxu1 (!%p265_p10), %v395_v1  ;;  %2453 = vmatpush3.bf16.msra.mxu0 (!%p265_p10), %v1192_v4  ;;  %v2278_v5 = vld [vmem:[%s3304_s3 + $0x18] sm:$0xf] (!%p265_p10)  ;;  %vm380_vm1 = vcmask (!%p265_p10), 64512   ;;  %v495_v6 = vsel (!%p265_p10), %vm393_vm0, %v346_v3, 0  ;;  %vm578_vm2 = vsmask.f32 (!%p265_p10), 3328 }
  0x13   : > { %2577 = vmatprep.subr.msk.bf16.mxu1 (!%p265_p10), %vm393_vm0, %v346_v3  ;;  %2582 = vmatprep.subr.msk.bf16.mxu0 (!%p265_p10), %vm393_vm0, %v2278_v5  ;;  %vm579_vm3 = vsmask.f32 (!%p265_p10), 7440  ;;  %v2202_v7 = vld [vmem:[%s3304_s3 + $0x8] sm:$0xf] (!%p265_p10)  ;;  %v2946_v11 = vsel (!%p265_p10), %vm393_vm0, %v2278_v5, 0  ;;  %p320_p12 = scmp.lt.s32.totalorder (!%p265_p10), %s2806_s24, 1 }
  0x14   : > { %v2949_v12 = vsel (!%p265_p10), %vm393_vm0, %v2202_v7, 0  ;;  %vm2964_vm4 = vmor (!%p265_p10), %vm578_vm2, %vm579_vm3  ;;  %vm1786_vm5 = vcmask (!%p265_p10), 261120   ;;  %s3181_s18 = sand.u32 (!%p265_p10), 1, %s2798_s22   ;;  %vm1957_vm7 = vcmask (!%p265_p10), 523264  }
  0x15   : > { %s2169_s19 = sshll.u32 (!%p265_p10), %s3181_s18, 5  ;;  %s1972_s14 = scalar_lea.sflag (!%p265_p10), [#allocation5], %s3181_s18 }
  0x18   : > { %s3320_s13 = smov (!%p314_p11, %s2171_s13), 7 }
  0x19   : > { %s2585_s20 = smul.u32 72, %s3320_s13  ;;  %s3202_s13 = scalar_lea.vmem [#allocation2], %s2169_s19 }
  0x1a   : > { %s3127_s28 = scalar_select %p320_p12, %s2806_s24, 1 }
  0x1b   : > { %s2935_s30 = scalar_lea.vmem %s3301_s0, %s2585_s20  ;;  %s312_s20 = scalar_lea.vmem [#allocation4], %s2169_s19 }
  0x1c   : > { %v2650_v8 = vld [vmem:[%s2935_s30 + $0x48] ss:$8 sps:$4 sm:$0xff]   ;;  %v2651_v9 = vld [vmem:[%s2935_s30 + $0x58] ss:$8 sps:$4 sm:$0xff]   ;;  %v2246_v14 = vld [vmem:[%s2935_s30 + $0x94] sm:$0x1] }
  0x1d   : > { %2404 = vmatprep.mubr.msk.bf16.mxu1 %vm380_vm1, %v2650_v8  ;;  %v2652_v10 = vld [vmem:[%s2935_s30 + $0x68] ss:$8 sps:$4 sm:$0xff]   ;;  %v2247_v15 = vld [vmem:[%s2935_s30 + $0x98] sm:$0xf]  ;;  %v2248_v17 = vld [vmem:[%s2935_s30 + $0x9c] sm:$0x1] }
  0x1e   : > { %2405 = vmatmul.mubr.msk.bf16.vlgmr.msra.gmra.mrb[0].mxu1 %vm380_vm1, %v2651_v9  ;;  %v2245_v13 = vld [vmem:[%s2935_s30 + $0x90] sm:$0xf]  ;;  %v2653_v16 = vld [vmem:[%s2935_s30 + $0x78] ss:$8 sps:$4 sm:$0xff]   ;;  %v1063_v20 = vshll.u32 %v2246_v14, 16  ;;  %v1068_v21 = vshrl.u32 %v2247_v15, 16 }
  0x1f   : > { %2408 = vmatprep.mubr.msk.bf16.mxu1 %vm380_vm1, %v2652_v10  ;;  %2413 = vmatpush3.bf16.msra.mxu1 %v495_v6  ;;  %v1054_v18 = vshrl.u32 %v2245_v13, 16  ;;  %v1057_v19 = vshll.u32 %v2245_v13, 16  ;;  %v1071_v22 = vshll.u32 %v2247_v15, 16  ;;  %v1077_v23 = vshll.u32 %v2248_v17, 16  ;;  %v2249_v24 = vld [vmem:[%s2935_s30 + $0xa0] sm:$0xf] }
  0x20   : > { %2578 = vmatprep.subr.msk.bf16.mxu1 %vm393_vm0, %v2202_v7  ;;  %v2250_v25 = vld [vmem:[%s2935_s30 + $0xa4] sm:$0x1]  ;;  %v1065_v28 = vrot.slane %v1063_v20, 5  ;;  %v1070_v29 = vrot.slane %v1068_v21, 4  ;;  %v2251_v30 = vld [vmem:[%s2935_s30 + $0xa8] sm:$0xf] }
  0x21   : > { %v1056_v26 = vrot.slane %v1054_v18, 4  ;;  %v1059_v27 = vrot.slane %v1057_v19, 5  ;;  %v1073_v31 = vrot.slane %v1071_v22, 5  ;;  %v1079_v32 = vrot.slane %v1077_v23, 5  ;;  %v2252_v33 = vld [vmem:[%s2935_s30 + $0xac] sm:$0x1] }
  0x22   : > { %v1082_v34 = vshrl.u32 %v2249_v24, 16  ;;  %v1085_v35 = vshll.u32 %v2249_v24, 16  ;;  %v1091_v37 = vshll.u32 %v2250_v25, 16  ;;  %v1096_v38 = vshrl.u32 %v2251_v30, 16  ;;  %v2654_v49 = vld [vmem:[%s2935_s30] ss:$8 sps:$4 sm:$0xff]  }
  0x23   : > { %v1060_v36 = vor.u32 %v1059_v27, %v1056_v26  ;;  %v1099_v39 = vshll.u32 %v2251_v30, 16  ;;  %v1074_v41 = vor.u32 %v1073_v31, %v1070_v29  ;;  %v1105_v44 = vshll.u32 %v2252_v33, 16  ;;  %v2655_v55 = vld [vmem:[%s2935_s30 + $0x10] ss:$8 sps:$4 sm:$0xff]   ;;  %v2254_v57 = vld [vmem:[%s2935_s30 + $0xb4] sm:$0x1] }
  0x24   : > { %v1084_v42 = vrot.slane %v1082_v34, 4  ;;  %v1087_v43 = vrot.slane %v1085_v35, 5  ;;  %v1093_v46 = vrot.slane %v1091_v37, 5  ;;  %v1098_v47 = vrot.slane %v1096_v38, 4  ;;  %v2253_v56 = vld [vmem:[%s2935_s30 + $0xb0] sm:$0xf] }
  0x25   : > { %v1061_v45 = vrot.slane %v1060_v36, 4  ;;  %v1101_v48 = vrot.slane %v1099_v39, 5  ;;  %v1075_v50 = vrot.slane %v1074_v41, 4  ;;  %v1107_v52 = vrot.slane %v1105_v44, 5  ;;  %v2255_v60 = vld [vmem:[%s2935_s30 + $0xb8] sm:$0xf] }
  0x26   : > { %2409 = vmatmul.mubr.msk.bf16.gmra.mrb[4].mxu1 %vm380_vm1, %v2653_v16  ;;  %v1088_v51 = vor.u32 %v1087_v43, %v1084_v42  ;;  %v2256_v61 = vld [vmem:[%s2935_s30 + $0xbc] sm:$0x1]  ;;  %v1110_v62 = vshrl.u32 %v2253_v56, 16  ;;  %v1113_v1 = vshll.u32 %v2253_v56, 16  ;;  %v1119_v2 = vshll.u32 %v2254_v57, 16  ;;  %s2347_s12 = sshll.u32 %s3127_s28, 5 }
  0x27   : > { %v1066_v53 = vsel %vm2964_vm4, %v1061_v45, %v1065_v28  ;;  %v1102_v54 = vor.u32 %v1101_v48, %v1098_v47  ;;  %2414 = vmatprep.mubr.msk.bf16.mxu1 %vm380_vm1, %v2654_v49  ;;  %v1080_v58 = vsel %vm2964_vm4, %v1075_v50, %v1079_v32  ;;  %v2257_v3 = vld [vmem:[%s2935_s30 + $0xc0] sm:$0xf]  ;;  %v1124_v6 = vshrl.u32 %v2255_v60, 16  ;;  %v2258_v8 = vld [vmem:[%s2935_s30 + $0xc4] sm:$0x1]  ;;  %s324_s15 = scalar_lea.vmem %s3302_s1, %s2347_s12  ;;  %s332_s17 = scalar_lea.vmem %s3303_s2, %s2347_s12 }
  0x28   : > { %v1089_v59 = vrot.slane %v1088_v51, 4  ;;  %v2262_v63 = vcombine.low %v1066_v53, %v1080_v58  ;;  %v1112_v5 = vrot.slane %v1110_v62, 4  ;;  %v1127_v7 = vshll.u32 %v2255_v60, 16  ;;  %v2987_v9 = vld [vmem:[%s3304_s3 + $0xc] sm:$0xf]  ;;  %s2003_s27 = sshll.u32 %s312_s20, 4  ;;  %s3197_s27 = int_to_ptr.vmem [resolvable:$true] %s2003_s27 }
  0x29   : > { %v1103_v0 = vrot.slane %v1102_v54, 4  ;;  %v1115_v13 = vrot.slane %v1113_v1, 5  ;;  %v1121_v14 = vrot.slane %v1119_v2, 5  ;;  %v1133_v15 = vshll.u32 %v2256_v61, 16  ;;  %v2259_v16 = vld [vmem:[%s2935_s30 + $0xc8] sm:$0xf] }
  0x2a   : > { %v1094_v4 = vsel %vm2964_vm4, %v1089_v59, %v1093_v46  ;;  %2454 = vmatprep.mubr.msk.bf16.mxu0 %vm380_vm1, %v2262_v63  ;;  %v2996_v17 = vld [vmem:[%s3304_s3 + $0x1c] sm:$0xf]  ;;  %v1126_v19 = vrot.slane %v1124_v6, 4  ;;  %v1129_v20 = vrot.slane %v1127_v7, 5  ;;  %v2260_v21 = vld [vmem:[%s2935_s30 + $0xcc] sm:$0x1] }
  0x2b   : > { %v1108_v10 = vsel %vm2964_vm4, %v1103_v0, %v1107_v52  ;;  %v1138_v22 = vshrl.u32 %v2257_v3, 16  ;;  %v1116_v23 = vor.u32 %v1115_v13, %v1112_v5  ;;  %v1135_v24 = vrot.slane %v1133_v15, 5  ;;  %v2656_v34 = vld [vmem:[%s2935_s30 + $0x20] ss:$8 sps:$4 sm:$0xff]   ;;  %v2657_v39 = vld [vmem:[%s2935_s30 + $0x30] ss:$8 sps:$4 sm:$0xff]  }
  0x2c   : > { %v2263_v18 = vcombine.low %v1094_v4, %v1108_v10  ;;  %v1141_v25 = vshll.u32 %v2257_v3, 16  ;;  %v1147_v26 = vshll.u32 %v2258_v8, 16  ;;  %v1130_v27 = vor.u32 %v1129_v20, %v1126_v19  ;;  %v2658_v47 = vld [vmem:[%s2935_s30 + $0x8] ss:$8 sps:$4 sm:$0xff]   ;;  %v562_v48 = vld [vmem:[%s2935_s30] sm:$0xf] }
  0x2d   : > { %v1140_v28 = vrot.slane %v1138_v22, 4  ;;  %v1152_v29 = vshrl.u32 %v2259_v16, 16  ;;  %v1155_v30 = vshll.u32 %v2259_v16, 16  ;;  %v1117_v31 = vrot.slane %v1116_v23, 4  ;;  %v563_v50 = vld [vmem:[%s2935_s30 + $0x4] sm:$0x1] }
  0x2e   : > { %2415 = vmatmul.mubr.msk.bf16.vlgmr.msra.gmra.mrb[0].mxu1 %vm380_vm1, %v2655_v55  ;;  %2455 = vmatmul.mubr.msk.bf16.vlgmr.msra.gmra.mrb[0].mxu0 %vm380_vm1, %v2263_v18  ;;  %v1143_v32 = vrot.slane %v1141_v25, 5  ;;  %v1161_v33 = vshll.u32 %v2260_v21, 16  ;;  %v1131_v35 = vrot.slane %v1130_v27, 4  ;;  %v1149_v38 = vrot.slane %v1147_v26, 5  ;;  %v564_v51 = vld [vmem:[%s2935_s30 + $0x8] sm:$0xf] }
  0x2f   : > { %2423 = vmatpush3.bf16.msra.mxu1 %v2949_v12  ;;  %2463 = vmatpush3.bf16.msra.mxu0 %v2946_v11  ;;  %v1154_v36 = vrot.slane %v1152_v29, 4  ;;  %v1157_v37 = vrot.slane %v1155_v30, 5  ;;  %v1122_v12 = vsel %vm2964_vm4, %v1117_v31, %v1121_v14  ;;  %v565_v52 = vld [vmem:[%s2935_s30 + $0xc] sm:$0x1]  ;;  %v582_v54 = vshrl.u32 %v562_v48, 16  ;;  %s2349_s28 = sshll.u32 %s2806_s24, 9 }
  0x30   : > { %2579 = vmatprep.subr.msk.bf16.mxu1 %vm393_vm0, %v2987_v9  ;;  %2583 = vmatprep.subr.msk.bf16.mxu0 %vm393_vm0, %v2996_v17  ;;  %v1144_v11 = vor.u32 %v1143_v32, %v1140_v28  ;;  %v1136_v41 = vsel %vm2964_vm4, %v1131_v35, %v1135_v24  ;;  %v1163_v43 = vrot.slane %v1161_v33, 5  ;;  %v585_v55 = vshll.u32 %v562_v48, 16  ;;  %v566_v57 = vld [vmem:[%s2935_s30 + $0x10] sm:$0xf]  ;;  %v567_v62 = vld [vmem:[%s2935_s30 + $0x14] sm:$0x1]  ;;  %s3195_s12 = scalar_lea.hbm %s3307_s6, %s2349_s28 }
  0x31   : > { %2418 = vmatprep.mubr.msk.bf16.mxu1 %vm380_vm1, %v2656_v34  ;;  %v1158_v42 = vor.u32 %v1157_v37, %v1154_v36  ;;  %v2264_v44 = vcombine.low %v1122_v12, %v1136_v41  ;;  %v591_v56 = vshll.u32 %v563_v50, 16  ;;  %v596_v59 = vshrl.u32 %v564_v51, 16  ;;  %v568_v2 = vld [vmem:[%s2935_s30 + $0x18] sm:$0xf]  ;;  %v569_v7 = vld [vmem:[%s2935_s30 + $0x1c] sm:$0x1] }
  0x32   : > { %v1145_v45 = vrot.slane %v1144_v11, 4  ;;  %v599_v60 = vshll.u32 %v564_v51, 16  ;;  %v605_v61 = vshll.u32 %v565_v52, 16  ;;  %v584_v63 = vrot.slane %v582_v54, 4  ;;  %v2659_v21 = vld [vmem:[%s2935_s30 + $0x18] ss:$8 sps:$4 sm:$0xff]  }
  0x33   : > { %v1159_v46 = vrot.slane %v1158_v42, 4  ;;  %2458 = vmatprep.mubr.msk.bf16.mxu0 %vm380_vm1, %v2264_v44  ;;  %v587_v0 = vrot.slane %v585_v55, 5  ;;  %v593_v1 = vrot.slane %v591_v56, 5  ;;  %v610_v3 = vshrl.u32 %v566_v57, 16  ;;  %v2660_v29 = vld [vmem:[%s2935_s30 + $0x28] ss:$8 sps:$4 sm:$0xff]  }
  0x34   : > { %v1150_v49 = vsel %vm2964_vm4, %v1145_v45, %v1149_v38  ;;  %v598_v4 = vrot.slane %v596_v59, 4  ;;  %v601_v5 = vrot.slane %v599_v60, 5  ;;  %v607_v6 = vrot.slane %v605_v61, 5  ;;  %v570_v32 = vld [vmem:[%s2935_s30 + $0x20] sm:$0xf] }
  0x35   : > { %v1164_v53 = vsel %vm2964_vm4, %v1159_v46, %v1163_v43  ;;  %v613_v8 = vshll.u32 %v566_v57, 16  ;;  %v588_v10 = vor.u32 %v587_v0, %v584_v63  ;;  %v612_v13 = vrot.slane %v610_v3, 4  ;;  %v3041_v33 = vld [vmem:[%s3304_s3 + $0x20] sm:$0xf]  ;;  %v571_v37 = vld [vmem:[%s2935_s30 + $0x24] sm:$0x1] }
  0x36   : > { %2419 = vmatmul.mubr.msk.bf16.gmra.mrb[4].mxu1 %vm380_vm1, %v2657_v39  ;;  %v2265_v58 = vcombine.low %v1150_v49, %v1164_v53  ;;  %v619_v14 = vshll.u32 %v567_v62, 16  ;;  %v624_v15 = vshrl.u32 %v568_v2, 16  ;;  %v602_v16 = vor.u32 %v601_v5, %v598_v4  ;;  %v572_v12 = vld [vmem:[%s2935_s30 + $0x28] sm:$0xf]  ;;  %v573_v39 = vld [vmem:[%s2935_s30 + $0x2c] sm:$0x1] }
  0x37   : > { %v615_v18 = vrot.slane %v613_v8, 5  ;;  %v627_v19 = vshll.u32 %v568_v2, 16  ;;  %v633_v20 = vshll.u32 %v569_v7, 16  ;;  %v1435_v22 = vsel %vm393_vm0, %v2996_v17, 0  ;;  %v575_v52 = vld [vmem:[%s2935_s30 + $0x34] sm:$0x1] }
  0x38   : > { %2459 = vmatmul.mubr.msk.bf16.gmra.mrb[4].mxu0 %vm380_vm1, %v2265_v58  ;;  %v589_v23 = vrot.slane %v588_v10, 4  ;;  %v621_v24 = vrot.slane %v619_v14, 5  ;;  %v626_v25 = vrot.slane %v624_v15, 4  ;;  %v603_v26 = vrot.slane %v602_v16, 4  ;;  %v2661_v54 = vld [vmem:[%s2935_s30 + $0x38] ss:$8 sps:$4 sm:$0xff]  }
  0x39   : > { %2464 = vmatprep.mubr.msk.bf16.mxu0 %vm380_vm1, %v2658_v47  ;;  %v616_v27 = vor.u32 %v615_v18, %v612_v13  ;;  %v629_v28 = vrot.slane %v627_v19, 5  ;;  %v635_v31 = vrot.slane %v633_v20, 5  ;;  %v841_v17 = vsel %vm393_vm0, %v2987_v9, 0  ;;  %v574_v47 = vld [vmem:[%s2935_s30 + $0x30] sm:$0xf] }
  0x3a   : > { %v594_v30 = vsel %vm2964_vm4, %v589_v23, %v593_v1  ;;  %v608_v34 = vsel %vm2964_vm4, %v603_v26, %v607_v6  ;;  %v638_v11 = vshrl.u32 %v570_v32, 16  ;;  %v641_v41 = vshll.u32 %v570_v32, 16  ;;  %v576_v56 = vld [vmem:[%s2935_s30 + $0x38] sm:$0xf]  ;;  %v577_v57 = vld [vmem:[%s2935_s30 + $0x3c] sm:$0x1] }
  0x3b   : > { %v617_v35 = vrot.slane %v616_v27, 4  ;;  %v630_v36 = vor.u32 %v629_v28, %v626_v25  ;;  %v2203_v38 = vcombine.low %v594_v30, %v608_v34  ;;  %v647_v42 = vshll.u32 %v571_v37, 16  ;;  %v3067_v59 = vld [vmem:[%s3304_s3 + $0x10] sm:$0xf]  ;;  %v2663_v27 = vld [vmem:[%s2935_s30 + $0x60] ss:$8 sps:$4 sm:$0xff]  }
  0x3c   : > { %v652_v43 = vshrl.u32 %v572_v12, 16  ;;  %v640_v45 = vrot.slane %v638_v11, 4  ;;  %v655_v46 = vshll.u32 %v572_v12, 16  ;;  %v643_v48 = vrot.slane %v641_v41, 5  ;;  %v2662_v4 = vld [vmem:[%s2935_s30 + $0x50] ss:$8 sps:$4 sm:$0xff]  }
  0x3d   : > { %v622_v9 = vsel %vm2964_vm4, %v617_v35, %v621_v24  ;;  %v631_v44 = vrot.slane %v630_v36, 4  ;;  %2424 = vmatprep.mubr.msk.bf16.mxu1 %vm380_vm1, %v2203_v38  ;;  %v649_v49 = vrot.slane %v647_v42, 5  ;;  %v661_v51 = vshll.u32 %v573_v39, 16  ;;  %v3088_v28 = vld [vmem:[%s3305_s4] sm:$0xff]   ;;  %v2664_v30 = vld [vmem:[%s2935_s30 + $0x90] ss:$8 sps:$4 sm:$0xff]  }
  0x3e   : > { %v654_v50 = vrot.slane %v652_v43, 4  ;;  %v657_v55 = vrot.slane %v655_v46, 5  ;;  %v666_v58 = vshrl.u32 %v574_v47, 16  ;;  %v644_v61 = vor.u32 %v643_v48, %v640_v45  ;;  %v2666_v32 = vld [vmem:[%s2935_s30 + $0x70] ss:$8 sps:$4 sm:$0xff]  }
  0x3f   : > { %v636_v53 = vsel %vm2964_vm4, %v631_v44, %v635_v31  ;;  %v663_v62 = vrot.slane %v661_v51, 5  ;;  %v669_v63 = vshll.u32 %v574_v47, 16  ;;  %v675_v2 = vshll.u32 %v575_v52, 16  ;;  %v2305_v34 = vld [vmem:[%s2935_s30 + $0xc] sm:$0x1] }
  0x40   : > { %2465 = vmatmul.mubr.msk.bf16.vlgmr.msra.gmra.mrb[0].mxu0 %vm380_vm1, %v2659_v21  ;;  %v2204_v60 = vcombine.low %v622_v9, %v636_v53  ;;  %v658_v0 = vor.u32 %v657_v55, %v654_v50  ;;  %v668_v1 = vrot.slane %v666_v58, 4  ;;  %v680_v3 = vshrl.u32 %v576_v56, 16  ;;  %v2306_v35 = vld [vmem:[%s2935_s30 + $0x10] sm:$0xf]  ;;  %v2307_v36 = vld [vmem:[%s2935_s30 + $0x14] sm:$0x1] }
  0x41   : > { %2473 = vmatpush3.bf16.msra.mxu0 %v1435_v22  ;;  %2468 = vmatprep.mubr.msk.bf16.mxu0 %vm380_vm1, %v2660_v29  ;;  %v645_v5 = vrot.slane %v644_v61, 4  ;;  %v671_v6 = vrot.slane %v669_v63, 5  ;;  %v683_v7 = vshll.u32 %v576_v56, 16  ;;  %v689_v8 = vshll.u32 %v577_v57, 16  ;;  %v2308_v41 = vld [vmem:[%s2935_s30 + $0x18] sm:$0xf] }
  0x42   : > { %2584 = vmatprep.subr.msk.bf16.mxu0 %vm393_vm0, %v3041_v33  ;;  %2425 = vmatmul.mubr.msk.bf16.vlgmr.msra.gmra.mrb[0].mxu1 %vm380_vm1, %v2204_v60  ;;  %v659_v10 = vrot.slane %v658_v0, 4  ;;  %v682_v13 = vrot.slane %v680_v3, 4  ;;  %v677_v16 = vrot.slane %v675_v2, 5  ;;  %v1665_v26 = vsel %vm393_vm0, %v3041_v33, 0  ;;  %v2309_v9 = vld [vmem:[%s2935_s30 + $0x1c] sm:$0x1] }
  0x43   : > { %2433 = vmatpush3.bf16.msra.mxu1 %v841_v17  ;;  %v650_v14 = vsel %vm2964_vm4, %v645_v5, %v649_v49  ;;  %v672_v15 = vor.u32 %v671_v6, %v668_v1  ;;  %v685_v18 = vrot.slane %v683_v7, 5  ;;  %v691_v23 = vrot.slane %v689_v8, 5  ;;  %v2304_v17 = vld [vmem:[%s2935_s30 + $0x8] sm:$0xf]  ;;  %v2310_v44 = vld [vmem:[%s2935_s30 + $0x20] sm:$0xf] }
  0x44   : > { %2580 = vmatprep.subr.msk.bf16.mxu1 %vm393_vm0, %v3067_v59  ;;  %v664_v19 = vsel %vm2964_vm4, %v659_v10, %v663_v62  ;;  %v1527_v33 = vshrl.u32 %v2304_v17, 16  ;;  %v1530_v37 = vshll.u32 %v2304_v17, 16  ;;  %v1536_v12 = vshll.u32 %v2305_v34, 16  ;;  %v2665_v45 = vld [vmem:[%s2935_s30 + $0xa0] ss:$8 sps:$4 sm:$0xff]  }
  0x45   : > { %v2205_v20 = vcombine.low %v650_v14, %v664_v19  ;;  %v673_v21 = vrot.slane %v672_v15, 4  ;;  %v686_v22 = vor.u32 %v685_v18, %v682_v13  ;;  %v1541_v11 = vshrl.u32 %v2306_v35, 16  ;;  %v2667_v46 = vld [vmem:[%s2935_s30 + $0x80] ss:$8 sps:$4 sm:$0xff]   ;;  %v2311_v51 = vld [vmem:[%s2935_s30 + $0x24] sm:$0x1] }
  0x46   : > { %v1544_v38 = vshll.u32 %v2306_v35, 16  ;;  %v1550_v39 = vshll.u32 %v2307_v36, 16  ;;  %v1529_v42 = vrot.slane %v1527_v33, 4  ;;  %v1532_v43 = vrot.slane %v1530_v37, 5  ;;  %v2668_v61 = vld [vmem:[%s2935_s30 + $0xb0] ss:$8 sps:$4 sm:$0xff]  }
  0x47   : > { %2428 = vmatprep.mubr.msk.bf16.mxu1 %vm380_vm1, %v2205_v20  ;;  %v678_v24 = vsel %vm2964_vm4, %v673_v21, %v677_v16  ;;  %v687_v25 = vrot.slane %v686_v22, 4  ;;  %v1538_v47 = vrot.slane %v1536_v12, 5  ;;  %v1543_v48 = vrot.slane %v1541_v11, 4  ;;  %v2312_v10 = vld [vmem:[%s2935_s30 + $0x28] sm:$0xf] }
  0x48   : > { %2469 = vmatmul.mubr.msk.bf16.gmra.mrb[4].mxu0 %vm380_vm1, %v2661_v54  ;;  %v1546_v49 = vrot.slane %v1544_v38, 5  ;;  %v1552_v50 = vrot.slane %v1550_v39, 5  ;;  %v1533_v52 = vor.u32 %v1532_v43, %v1529_v42  ;;  %v1555_v53 = vshrl.u32 %v2308_v41, 16  ;;  %v2313_v14 = vld [vmem:[%s2935_s30 + $0x2c] sm:$0x1] }
  0x49   : > { %2474 = vmatprep.mubr.msk.bf16.mxu0 %vm380_vm1, %v2662_v4  ;;  %v692_v29 = vsel %vm2964_vm4, %v687_v25, %v691_v23  ;;  %v1558_v54 = vshll.u32 %v2308_v41, 16  ;;  %v1564_v55 = vshll.u32 %v2309_v9, 16  ;;  %v1569_v57 = vshrl.u32 %v2310_v44, 16  ;;  %v2314_v15 = vld [vmem:[%s2935_s30 + $0x30] sm:$0xf]  ;;  %v2673_v12 = vld [vmem:[%s3305_s4 + $0x8] sm:$0xff]  }
  0x4a   : > { %v2206_v31 = vcombine.low %v678_v24, %v692_v29  ;;  %v1547_v56 = vor.u32 %v1546_v49, %v1543_v48  ;;  %v1572_v58 = vshll.u32 %v2310_v44, 16  ;;  %v1578_v60 = vshll.u32 %v2311_v51, 16  ;;  %v2315_v16 = vld [vmem:[%s2935_s30 + $0x34] sm:$0x1]  ;;  %v2669_v22 = vld [vmem:[%s2935_s30 + $0xc0] ss:$8 sps:$4 sm:$0xff]  }
  0x4b   : > { %v1534_v62 = vrot.slane %v1533_v52, 4  ;;  %v1557_v63 = vrot.slane %v1555_v53, 4  ;;  %v1560_v0 = vrot.slane %v1558_v54, 5  ;;  %v962_v2 = vsel %vm393_vm0, %v3067_v59, 0  ;;  %v2317_v34 = vld [vmem:[%s2935_s30 + $0x3c] sm:$0x1] }
  0x4c   : > { %2429 = vmatmul.mubr.msk.bf16.gmra.mrb[4].mxu1 %vm380_vm1, %v2206_v31  ;;  %v1548_v1 = vrot.slane %v1547_v56, 4  ;;  %v1571_v3 = vrot.slane %v1569_v57, 4  ;;  %v1574_v4 = vrot.slane %v1572_v58, 5  ;;  %v1566_v7 = vrot.slane %v1564_v55, 5  ;;  %v2318_v11 = vld [vmem:[%s2935_s30 + $0x40] sm:$0xf] }
  0x4d   : > { %2434 = vmatprep.mubr.msk.bf16.mxu1 %vm380_vm1, %v2664_v30  ;;  %v1539_v5 = vsel %vm2964_vm4, %v1534_v62, %v1538_v47  ;;  %v1561_v6 = vor.u32 %v1560_v0, %v1557_v63  ;;  %v1580_v8 = vrot.slane %v1578_v60, 5  ;;  %v1583_v20 = vshrl.u32 %v2312_v10, 16  ;;  %v2671_v30 = vld [vmem:[%s2935_s30 + $0xd8] ss:$8 sps:$4 sm:$0xff]   ;;  %v2319_v42 = vld [vmem:[%s2935_s30 + $0x44] sm:$0x1] }
  0x4e   : > { %v1553_v13 = vsel %vm2964_vm4, %v1548_v1, %v1552_v50  ;;  %v1575_v59 = vor.u32 %v1574_v4, %v1571_v3  ;;  %v1586_v21 = vshll.u32 %v2312_v10, 16  ;;  %v1592_v24 = vshll.u32 %v2313_v14, 16  ;;  %v2672_v58 = vld [vmem:[%s2935_s30 + $0xe8] ss:$8 sps:$4 sm:$0xff]   ;;  %v2674_v1 = vld [vmem:[%s2935_s30 + $0xf8] ss:$8 sps:$4 sm:$0xff]  }
  0x4f   : > { %v2321_v18 = vcombine.low %v1539_v5, %v1553_v13  ;;  %v1562_v19 = vrot.slane %v1561_v6, 4  ;;  %v1597_v25 = vshrl.u32 %v2314_v15, 16  ;;  %v1585_v31 = vrot.slane %v1583_v20, 4  ;;  %v2676_v4 = vld [vmem:[%s324_s15] sm:$0xff]   ;;  %v2675_v6 = vld [vmem:[%s2935_s30 + $0x108] ss:$8 sps:$4 sm:$0xff]  }
  0x50   : > { %2475 = vmatmul.mubr.msk.bf16.vlgmr.msra.gmra.mrb[0].mxu0 %vm380_vm1, %v2663_v27  ;;  %v1576_v23 = vrot.slane %v1575_v59, 4  ;;  %v2316_v27 = vld [vmem:[%s2935_s30 + $0x38] sm:$0xf]  ;;  %v1606_v17 = vshll.u32 %v2315_v16, 16  ;;  %v1594_v36 = vrot.slane %v1592_v24, 5  ;;  %v1628_v49 = vshll.u32 %v2318_v11, 16 }
  0x51   : > { %2483 = vmatpush3.bf16.msra.mxu0 %v1665_v26  ;;  %2478 = vmatprep.mubr.msk.bf16.mxu0 %vm380_vm1, %v2666_v32  ;;  %v1600_v26 = vshll.u32 %v2314_v15, 16  ;;  %v1567_v29 = vsel %vm2964_vm4, %v1562_v19, %v1566_v7  ;;  %v1588_v32 = vrot.slane %v1586_v21, 5  ;;  %v1599_v33 = vrot.slane %v1597_v25, 4  ;;  %v2677_v7 = vld [vmem:[%s324_s15 + $0x8] sm:$0xff]   ;;  %v2679_v10 = vld [vmem:[%s324_s15 + $0x18] sm:$0xff]   ;;  %s2818_s30 = smov [#allocation4]  }
  0x52   : > { %2492 = vmatprep.subr.bf16.mxu0 %v3088_v28  ;;  %v1581_v35 = vsel %vm2964_vm4, %v1576_v23, %v1580_v8  ;;  %v1608_v41 = vrot.slane %v1606_v17, 5  ;;  %v1611_v43 = vshrl.u32 %v2316_v27, 16  ;;  %v1614_v44 = vshll.u32 %v2316_v27, 16  ;;  %v2678_v8 = vld [vmem:[%s324_s15 + $0x10] sm:$0xff]   ;;  %s2704_s15 = scalar_lea.vmem %s3197_s27, 512  ;;  %s2708_s16 = sshll.u32 %s2818_s30, 4  ;;  %s2709_s16 = int_to_ptr.vmem [resolvable:$false] %s2708_s16 }
  0x53   : > { %v1602_v37 = vrot.slane %v1600_v26, 5  ;;  %v2322_v38 = vcombine.low %v1567_v29, %v1581_v35  ;;  %v1589_v39 = vor.u32 %v1588_v32, %v1585_v31  ;;  %v1634_v50 = vshll.u32 %v2319_v42, 16  ;;  %p2705_p13 = scmp.ne.s32.totalorder %s3197_s27, %s2704_s15  ;;  %p2711_p2 = scmp.lt.s32.totalorder %s3197_s27, %s2709_s16 }
  0x54   : > { %2435 = vmatmul.mubr.msk.bf16.vlgmr.msra.gmra.mrb[0].mxu1 %vm380_vm1, %v2665_v45  ;;  %v1620_v45 = vshll.u32 %v2317_v34, 16  ;;  %v1613_v48 = vrot.slane %v1611_v43, 4  ;;  %v1616_v52 = vrot.slane %v1614_v44, 5  ;;  %v1630_v56 = vrot.slane %v1628_v49, 5 }
  0x55   : > { %2438 = vmatprep.mubr.msk.bf16.mxu1 %vm380_vm1, %v2668_v61  ;;  %2443 = vmatpush3.bf16.msra.mxu1 %v962_v2  ;;  %v1603_v9 = vor.u32 %v1602_v37, %v1599_v33  ;;  %v1590_v47 = vrot.slane %v1589_v39, 4  ;;  %v1636_v57 = vrot.slane %v1634_v50, 5  ;;  %v1880_v23 = vlaneseq  ;;  %p2706_p0 = pnand %p2705_p13, %p2897_p4 }
  0x56   : > { %v1622_v55 = vrot.slane %v1620_v45, 5  ;;  %v2817_v39 = vmov 0.0  }
  0x57   : > { %v1604_v51 = vrot.slane %v1603_v9, 4  ;;  %v1595_v54 = vsel %vm2964_vm4, %v1590_v47, %v1594_v36  ;;  %p2707_p1 = pneg %p2706_p0 }
  0x58   : > { %2479 = vmatmul.mubr.msk.bf16.gmra.mrb[4].mxu0 %vm380_vm1, %v2667_v46  ;;  %v1625_v46 = vshrl.u32 %v2318_v11, 16 }
  0x59   : > { %2484 = vmatprep.mubr.msk.bf16.mxu0 %vm380_vm1, %v2321_v18  ;;  %v1609_v60 = vsel %vm2964_vm4, %v1604_v51, %v1608_v41 }
  0x5a   : > { %v1627_v53 = vrot.slane %v1625_v46, 4  ;;  %v2323_v61 = vcombine.low %v1595_v54, %v1609_v60 }
  0x5c   : > { %2439 = vmatmul.mubr.msk.bf16.gmra.mrb[4].mxu1 %vm380_vm1, %v2669_v22  ;;  %v1631_v62 = vor.u32 %v1630_v56, %v1627_v53 }
  0x5d   : > { %2444 = vmatprep.mubr.msk.bf16.mxu1 %vm380_vm1, %v2671_v30  ;;  %v1881_v30 = vand.u32 127, %v1880_v23  ;;  %v1935_v23 = vld [vmem:[%s332_s17 + $0x10] sm:$0xff] }
  0x5e   : > { %v1632_v0 = vrot.slane %v1631_v62, 4 }
  0x5f   : > { %vm1882_vm6 = vcmp.lt.s32.totalorder %v1881_v30, 96 }
  0x60   : > { %2485 = vmatmul.mubr.msk.bf16.vlgmr.msra.gmra.mrb[0].mxu0 %vm380_vm1, %v2322_v38  ;;  %v1637_v3 = vsel %vm2964_vm4, %v1632_v0, %v1636_v57  ;;  %v1892_v41 = vsel %vm1882_vm6, 0.5, %v2817_v39 }
  0x61   : > { %2493 = vmatpush3.bf16.msra.mxu0 %v3088_v28  ;;  %v1617_v28 = vor.u32 %v1616_v52, %v1613_v48  ;;  %2488 = vmatprep.mubr.msk.bf16.mxu0 %vm380_vm1, %v2323_v61 }
  0x62   : > { %2494 = vmatprep.subr.bf16.mxu0 %v2673_v12 }
  0x63   : > { %v1618_v63 = vrot.slane %v1617_v28, 4 }
  0x64   : > { %2445 = vmatmul.mubr.msk.bf16.vlgmr.msra.gmra.mrb[0].mxu1 %vm380_vm1, %v2672_v58 }
  0x65   : > { %2495 = vmatpush3.bf16.msra.mxu0 %v2673_v12  ;;  %v1623_v2 = vsel %vm2964_vm4, %v1618_v63, %v1622_v55  ;;  %2448 = vmatprep.mubr.msk.bf16.mxu1 %vm380_vm1, %v2674_v1  ;;  %v2816_v12 = vmov 1.0  }
  0x66   : > { %v2324_v5 = vcombine.low %v1623_v2, %v1637_v3  ;;  %v1883_v11 = vsel %vm1882_vm6, 0.5, %v2816_v12 }
  0x68   : > { %2489 = vmatmul.mubr.msk.bf16.gmra.mrb[4].mxu0 %vm380_vm1, %v2324_v5 }
  0x69   : > { %2496 = vmatprep.mubr.msk.bf16.mxu0 %vm1786_vm5, %v2676_v4 }
  0x6c   : > { %2449 = vmatmul.mubr.msk.bf16.gmra.mrb[4].mxu1 %vm380_vm1, %v2675_v6 }
  0x70   : > { %2497 = vmatmul.mubr.msk.bf16.vlgmr.msra.gmra.mrb[0].mxu0 %vm1786_vm5, %v2677_v7 }
  0x71   : > { %2500 = vmatprep.mubr.msk.bf16.mxu0 %vm1786_vm5, %v2678_v8 }
  0x78   : > { %2501 = vmatmul.mubr.msk.bf16.gmra.mrb[4].mxu0 %vm1786_vm5, %v2679_v10 }
 0x137   : > { %v2446_v40 = vpop.f32.mrb[0].mxu1 }
 0x138   : > { %v998_v13 = vpop.f32.mrb[1].mxu1 }
 0x139   : > { %v2447_v59 = vpop.f32.mrb[2].mxu1 }
 0x13a   : > { %v1001_v14 = vpop.f32.mrb[3].mxu1 }
 0x13f   : > { %v2450_v15 = vpop.f32.mrb[4].mxu1 }
 0x140   : > { %v1014_v16 = vpop.f32.mrb[5].mxu1 }
 0x141   : > { %v2451_v19 = vpop.f32.mrb[6].mxu1 }
 0x142   : > { %v1017_v22 = vpop.f32.mrb[7].mxu1 }
 0x143   : > { %v2498_v18 = vpop.f32.mrb[0].mxu0 }
 0x144   : > { %v2504_v20 = vadd.f32 %v2498_v18, %v2446_v40  ;;  %v1833_v21 = vpop.f32.mrb[1].mxu0  ;;  %v1934_v18 = vld [vmem:[%s332_s17 + $0x8] sm:$0xff] }
 0x145   : > { %v2505_v24 = vadd.f32 %v1833_v21, %v998_v13  ;;  %v2499_v25 = vpop.f32.mrb[2].mxu0 }
 0x146   : > { %v2506_v26 = vadd.f32 %v2499_v25, %v2447_v59  ;;  %v1836_v27 = vpop.f32.mrb[3].mxu0  ;;  %v1933_v59 = vld [vmem:[%s332_s17] sm:$0xff] }
 0x147   : > { %2680 = vtanh.f32 %v2505_v24  ;;  %v2507_v29 = vadd.f32 %v1836_v27, %v1001_v14 }
 0x149   : > { %2682 = vtanh.f32 %v2507_v29  ;;  %v1936_v29 = vld [vmem:[%s332_s17 + $0x18] sm:$0xff]  ;;  %s2710_s17 = scalar_lea.vmem %s2709_s16, 1024 }
 0x14a   : > { %2684 = vtanh.f32 %v2504_v20  ;;  %p2712_p3 = scmp.lt.s32.totalorder %s2710_s17, %s2704_s15 }
 0x14b   : > { %v2502_v31 = vpop.f32.mrb[4].mxu0  ;;  %2686 = vtanh.f32 %v2506_v26 }
 0x14c   : > { %v2508_v32 = vadd.f32 %v2502_v31, %v2450_v15  ;;  %v1849_v17 = vpop.f32.mrb[5].mxu0  ;;  %p2713_p5 = por %p2712_p3, %p2711_p2 }
 0x14d   : > { %v2509_v34 = vadd.f32 %v1849_v17, %v1014_v16  ;;  %v2503_v35 = vpop.f32.mrb[6].mxu0 }
 0x14e   : > { %v2510_v36 = vadd.f32 %v2503_v35, %v2451_v19  ;;  %v1852_v33 = vpop.f32.mrb[7].mxu0  ;;  %p2714_p6 = pnand %p2713_p5, %p2707_p1 }
 0x14f   : > { %v2511_v37 = vadd.f32 %v1852_v33, %v1017_v22  ;;  %2688 = vtanh.f32 %v2509_v34 }
 0x151   : > { %v2681_v38 = vpop.eup %2680  ;;  %2690 = vtanh.f32 %v2511_v37 }
 0x152   : > { %v1884_v42 = vmul.f32 %v2681_v38, %v1883_v11  ;;  %2692 = vtanh.f32 %v2508_v32 }
 0x153   : > { %v2683_v43 = vpop.eup %2682  ;;  %2694 = vtanh.f32 %v2510_v36 }
 0x154   : > { %v1893_v9 = vadd.f32 %v1892_v41, %v1884_v42  ;;  %v1885_v44 = vmul.f32 %v2683_v43, %v1883_v11  ;;  %v2685_v45 = vpop.eup %2684 }
 0x155   : > { %v1886_v47 = vmul.f32 %v2685_v45, %v1883_v11  ;;  %v2687_v48 = vpop.eup %2686 }
 0x156   : > { %1901 = vxpose.xlu0.b32.start [1/8] (short) %v1893_v9, 128  ;;  %v1894_v46 = vadd.f32 %v1892_v41, %v1885_v44  ;;  %v1887_v50 = vmul.f32 %v2687_v48, %v1883_v11 }
 0x157   : > { %v1895_v49 = vadd.f32 %v1892_v41, %v1886_v47 }
 0x158   : > { %v1896_v52 = vadd.f32 %v1892_v41, %v1887_v50 }
 0x159   : > { %v2689_v51 = vpop.eup %2688 }
 0x15a   : > { %1902 = vxpose.xlu0.b32.cont [2/8] (short) %v1894_v46, 128  ;;  %v1888_v53 = vmul.f32 %v2689_v51, %v1883_v11 }
 0x15b   : > { %v2691_v54 = vpop.eup %2690 }
 0x15c   : > { %v1897_v55 = vadd.f32 %v1892_v41, %v1888_v53  ;;  %v1889_v56 = vmul.f32 %v2691_v54, %v1883_v11  ;;  %v2693_v57 = vpop.eup %2692 }
 0x15d   : > { %v1890_v60 = vmul.f32 %v2693_v57, %v1883_v11  ;;  %v2695_v28 = vpop.eup %2694 }
 0x15e   : > { %1903 = vxpose.xlu0.b32.cont [3/8] (short) %v1895_v49, 128  ;;  %v1898_v58 = vadd.f32 %v1892_v41, %v1889_v56  ;;  %v1891_v62 = vmul.f32 %v2695_v28, %v1883_v11 }
 0x15f   : > { %v1899_v61 = vadd.f32 %v1892_v41, %v1890_v60 }
 0x160   : > { %v1900_v63 = vadd.f32 %v1892_v41, %v1891_v62 }
 0x162   : > { %1904 = vxpose.xlu0.b32.cont [4/8] (short) %v1896_v52, 128 }
 0x166   : > { %1905 = vxpose.xlu0.b32.cont [5/8] (short) %v1897_v55, 128 }
 0x16a   : > { %1906 = vxpose.xlu0.b32.cont [6/8] (short) %v1898_v58, 128 }
 0x16e   : > { %1907 = vxpose.xlu0.b32.cont [7/8] (short) %v1899_v61, 128 }
 0x172   : > { %1908 = vxpose.xlu0.b32.end [8/8] (short) %v1900_v63, 128 }
 0x1d6   : > { %v1917_v0 = vpop.trf.xlu0 }
 0x1da   : > { %v1918_v1 = vpop.trf.xlu0 }
 0x1de   : > { %v1919_v2 = vpop.trf.xlu0 }
 0x1e2   : > { %v1920_v3 = vpop.trf.xlu0 }
 0x1e6   : > { %v1921_v4 = vpop.trf.xlu0 }
 0x1e7   : > { %v1937_v15 = vmul.f32 %v1933_v59, %v1921_v4 }
 0x1ea   : > { %v1922_v5 = vpop.trf.xlu0 }
 0x1eb   : > { %v1938_v21 = vmul.f32 %v1934_v18, %v1922_v5 }
 0x1ee   : > { %v1923_v6 = vpop.trf.xlu0 }
 0x1ef   : > { %v1939_v26 = vmul.f32 %v1935_v23, %v1923_v6 }
 0x1f2   : > { %v1924_v7 = vpop.trf.xlu0 }
 0x1f3   : > { %v1940_v32 = vmul.f32 %v1936_v29, %v1924_v7 }
 0x1f6   : > { %v1925_v8 = vpop.trf.xlu0 }
 0x1fa   : > { %v3169_v10 = vpop.trf.xlu0 }
 0x1fe   : > { %v3171_v40 = vpop.trf.xlu0 }
 0x202   : > { %v3178_v13 = vpop.trf.xlu0 }
 0x206   : > { %v1929_v14 = vpop.trf.xlu0 }
 0x207   : > { %v1941_v16 = vmul.f32 %v1929_v14, %v1917_v0 }
 0x209   : > { %v1945_v19 = vadd.f32 %v1941_v16, %v1937_v15 }
 0x20a   : > { %v1930_v20 = vpop.trf.xlu0 }
 0x20b   : > { %2696 = vtanh.f32 %v1945_v19  ;;  %1962 = vst.msk [vmem:[%s312_s20] sm:$0xff] %vm1957_vm7, %v1945_v19  ;;  %v1942_v22 = vmul.f32 %v1930_v20, %v1918_v1 }
 0x20d   : > { %v1946_v24 = vadd.f32 %v1942_v22, %v1938_v21 }
 0x20e   : > { %v1931_v25 = vpop.trf.xlu0 }
 0x20f   : > { %2698 = vtanh.f32 %v1946_v24  ;;  %1963 = vst.msk [vmem:[%s312_s20 + $0x8] sm:$0xff] %vm1957_vm7, %v1946_v24  ;;  %v1943_v27 = vmul.f32 %v1931_v25, %v1919_v2 }
 0x211   : > { %v1947_v30 = vadd.f32 %v1943_v27, %v1939_v26 }
 0x212   : > { %v1932_v31 = vpop.trf.xlu0 }
 0x213   : > { %2700 = vtanh.f32 %v1947_v30  ;;  %1964 = vst.msk [vmem:[%s312_s20 + $0x10] sm:$0xff] %vm1957_vm7, %v1947_v30  ;;  %v1944_v17 = vmul.f32 %v1932_v31, %v1920_v3 }
 0x215   : > { %v2697_v34 = vpop.eup %2696  ;;  %v1948_v35 = vadd.f32 %v1944_v17, %v1940_v32 }
 0x216   : > { %v1953_v36 = vmul.f32 %v2697_v34, %v1925_v8 }
 0x217   : > { %2702 = vtanh.f32 %v1948_v35  ;;  %1965 = vst.msk [vmem:[%s312_s20 + $0x18] sm:$0xff] %vm1957_vm7, %v1948_v35 }
 0x218   : > { %1958 = vst.msk [vmem:[%s3202_s13] sm:$0xff] %vm1957_vm7, %v1953_v36 }
 0x219   : > { %2717 = shalt.err (!%p2714_p6)
}
 0x21a   : > { %s2718_s19 = scalar_lea.hbm %s3195_s12, 512  ;;  %s2722_s11 = scalar_lea.hbm %s3307_s6, 1024 }
 0x21b   : > { %p2719_p7 = scmp.ne.s32.totalorder %s3195_s12, %s2718_s19  ;;  %p2723_p11 = scmp.lt.u32.totalorder %s3195_s12, %s3307_s6 }
 0x21c   : > { %p2724_p12 = scmp.lt.u32.totalorder %s2722_s11, %s2718_s19  ;;  %p2726_p0 = scmp.lt.u32.totalorder %s2718_s19, %s3195_s12 }
 0x21d   : > { %p2720_p9 = pnand %p2719_p7, %p2897_p4 }
 0x21e   : > { %p2725_p13 = por %p2724_p12, %p2723_p11 }
 0x21f   : > { %p2721_p10 = pneg %p2720_p9 }
 0x220   : > { %p2727_p1 = por %p2726_p0, %p2725_p13 }
 0x222   : > { %p2728_p2 = pnand %p2727_p1, %p2721_p10 }
 0x224   : > { %2731 = shalt.err (!%p2728_p2)
}
 0x225   : > { %s2819_s15 = smov 128   ;;  %s2820_s17 = smov 8   ;;  %v2699_v33 = vpop.eup %2698 }
 0x226   : > { %2587 = dma.vmem_to_hbm [thread:$0]  (%p2897_p4), %s3197_s27, 512, %s3195_s12, %s1972_s14, %s2819_s15, %s2819_s15, %s2820_s17   ;;  %v1954_v37 = vmul.f32 %v2699_v33, %v3169_v10  ;;  %v2701_v12 = vpop.eup %2700 }
 0x227   : > { %v1955_v11 = vmul.f32 %v2701_v12, %v3171_v40  ;;  %s1986_s19 = sshll.u32 %s3202_s13, 4  ;;  %v2703_v38 = vpop.eup %2702  ;;  %s3246_s27 = scalar_lea.hbm %s3306_s5, %s2349_s28  ;;  %s3248_s19 = int_to_ptr.vmem [resolvable:$true] %s1986_s19 }
 0x228   : > { %1959 = vst.msk [vmem:[%s3202_s13 + $0x8] sm:$0xff] %vm1957_vm7, %v1954_v37  ;;  %v1956_v39 = vmul.f32 %v2703_v38, %v3178_v13  ;;  %s1967_s12 = scalar_lea.sflag [#allocation3], %s3181_s18  ;;  %s2732_s14 = scalar_lea.vmem %s3248_s19, 512 }
 0x229   : > { %1960 = vst.msk [vmem:[%s3202_s13 + $0x10] sm:$0xff] %vm1957_vm7, %v1955_v11  ;;  %p2733_p3 = scmp.ne.s32.totalorder %s3248_s19, %s2732_s14  ;;  %s2821_s11 = smov [#allocation2]  }
 0x22a   : > { %1961 = vst.msk [vmem:[%s3202_s13 + $0x18] sm:$0xff] %vm1957_vm7, %v1956_v39  ;;  %s2736_s24 = sshll.u32 %s2821_s11, 4  ;;  %s2737_s24 = int_to_ptr.vmem [resolvable:$false] %s2736_s24 }
 0x22b   : > { %p2734_p5 = pnand %p2733_p3, %p2897_p4  ;;  %s2738_s30 = scalar_lea.vmem %s2737_s24, 1024 }
 0x22c   : > { %p2739_p7 = scmp.lt.s32.totalorder %s3248_s19, %s2737_s24  ;;  %p2740_p9 = scmp.lt.s32.totalorder %s2738_s30, %s2732_s14 }
 0x22d   : > { %p2735_p6 = pneg %p2734_p5 }
 0x22e   : > { %p2741_p10 = por %p2740_p9, %p2739_p7 }
 0x230   : > { %p2742_p11 = pnand %p2741_p10, %p2735_p6 }
 0x232   : > { %2745 = shalt.err (!%p2742_p11)
}
 0x233   : > { %s2746_s28 = scalar_lea.hbm %s3246_s27, 512  ;;  %s2750_s20 = scalar_lea.hbm %s3306_s5, 1024 }
 0x234   : > { %p2747_p12 = scmp.ne.s32.totalorder %s3246_s27, %s2746_s28  ;;  %p2751_p1 = scmp.lt.u32.totalorder %s3246_s27, %s3306_s5 }
 0x235   : > { %p2752_p2 = scmp.lt.u32.totalorder %s2750_s20, %s2746_s28  ;;  %p2754_p5 = scmp.lt.u32.totalorder %s2746_s28, %s3246_s27 }
 0x236   : > { %p2748_p13 = pnand %p2747_p12, %p2897_p4 }
 0x237   : > { %p2753_p3 = por %p2752_p2, %p2751_p1 }
 0x238   : > { %p2749_p0 = pneg %p2748_p13 }
 0x239   : > { %p2755_p6 = por %p2754_p5, %p2753_p3 }
 0x23b   : > { %p2756_p7 = pnand %p2755_p6, %p2749_p0 }
 0x23d   : > { %2759 = shalt.err (!%p2756_p7)
}
 0x23e   : > { %2586 = dma.vmem_to_hbm [thread:$0]  (%p2897_p4), %s3248_s19, 512, %s3246_s27, %s1967_s12, %s2819_s15, %s2819_s15, %s2820_s17  }
 0x23f PF: > { %p2597_p9 = scmp.ge.s32.totalorder %s2814_s26, 2  ;;  %s2018_s14 = sand.u32 1, %s2794_s21  }
 0x240   : > { %s2019_s24 = scalar_lea.sflag [#allocation3], %s2018_s14 }
 0x241   : > { %p2591_p10 = pnand %p2597_p9, %p2904_p8 }
 0x243   : > { %2785 = dma.done.wait (!%p2591_p10), %s2019_s24, 512  }
 0x244   : > { %2787 = vsyncadd (!%p2591_p10), %s2019_s24, 4294966784  ;;  %s2028_s7 = scalar_lea.sflag [#allocation5], %s2018_s14 }
 0x245   : > { %2789 = dma.done.wait (!%p2591_p10), %s2028_s7, 512  }
 0x246   : > { %2791 = vsyncadd (!%p2591_p10), %s2028_s7, 4294966784  ;;  %s23_s26 = sadd.s32 1, %s2814_s26   ;;  %s3312_s21 = smov %s2798_s22 }
 0x247   : > { %p20_p11 = scmp.ge.s32.totalorder %s23_s26, 4   ;;  %s3313_s22 = smov %s2802_s23 }
 0x248   : > { %s3314_s23 = smov %s2910_s10  ;;  %s3315_s24 = smov %s2810_s25 }
 0x249   : > { %s3316_s25 = smov %s3318_s29  ;;  %22 = sbr.rel (!%p20_p11) target bundleno = 6 (0x6), region = 113 }
 0x250   :  { %2033 = vsyncpa [#allocation3], 1 }
 0x251   :  { %2035 = vsyncpa [#allocation3 + $0x1], 1 }
 0x252   :  { %2036 = vsyncpa [#allocation5], 1 }
 0x253   :  { %2038 = vsyncpa [#allocation5 + $0x1], 1 }

</bundles_post_ra>
